<compile_context>
chip_gen: v6e
topology: v6e:2x2x1
jax: 0.10.0
libtpu: 0.0.40
codegen_flags: <defaults>
</compile_context>

<pallas_src>
import functools
import math

import jax
import jax.numpy as jnp
from jax.experimental import pallas as pl
from jax.experimental.pallas import tpu as pltpu


# ---------------------------------------------------------------------------
# helpers
# ---------------------------------------------------------------------------
def _device_kind():
    try:
        return jax.devices()[0].device_kind.lower()
    except Exception:
        return ""


def _tpu_vmem_capacity_bytes():
    """Physical VMEM per core (generation-aware), with conservative fallback."""
    try:
        return int(pltpu.get_tpu_info().vmem_capacity_bytes)
    except Exception:
        return (64 << 20) if "v7" in _device_kind() else (128 << 20)


def _vmem_limit_bytes(*shape_dtype_pairs):
    """Explicit VMEM budget: double-buffered blocks + headroom, clamped to
    0.75x of the chip's physical VMEM (48 MiB on v7x, 96 MiB on v5e/v6e)."""
    total = 0
    for shape, dtype in shape_dtype_pairs:
        n = 1
        for d in shape:
            n *= int(d)
        total += n * jnp.dtype(dtype).itemsize
    cap = int(0.75 * _tpu_vmem_capacity_bytes())
    est = 2 * total + (4 << 20)
    return int(min(max(est, min(32 << 20, cap)), cap))


def _pick_tile(n, target):
    """Largest power-of-two tile <= target that divides n, else n itself."""
    t = target
    while t >= 8:
        if t <= n and n % t == 0:
            return t
        t //= 2
    return n


def _const_spec(shape):
    """BlockSpec for a grid-invariant operand (1-D grid): single-buffered."""
    return pl.BlockSpec(shape, lambda r: tuple(0 for _ in shape),
                        pipeline_mode=pl.Buffered(1))


# ---------------------------------------------------------------------------
# kernel 1: fused QKV projection  (x @ [wq*scale | wk | wv] + [bq*scale|bk|bv])
# ---------------------------------------------------------------------------
def qkv_proj_kernel(x_ref, w_ref, b_ref, qkv_ref):
    x = x_ref[...].astype(jnp.bfloat16)                         # (tr, D)
    acc = jnp.dot(x, w_ref[...], preferred_element_type=jnp.float32)
    acc = acc + b_ref[...]                                      # bias add in f32
    qkv_ref[...] = acc.astype(qkv_ref.dtype)


# ---------------------------------------------------------------------------
# kernel 2: attention, full K/V resident per (batch, q-tile)
#   refs: q (1,tq,D)  k,v (1,S,D)  out (1,tq,D)   (D = H*dh, lane-dense)
#   head split/merge is an in-VMEM relayout; per-head matmuls stay batched
#   einsums with a leading head axis. 1/sqrt(dh) already folded into Q.
# ---------------------------------------------------------------------------
def attn_kernel(q_ref, k_ref, v_ref, o_ref, *, num_heads, head_dim):
    H, dh = num_heads, head_dim

    def split_heads(ref):
        x = ref[0]                                              # (rows, H*dh) bf16
        # lane slices -> stack on a new leading (head) axis: (H, rows, dh)
        return jnp.stack([x[:, h * dh:(h + 1) * dh] for h in range(H)], axis=0)

    q = split_heads(q_ref)                                      # (H, tq, dh) bf16
    k = split_heads(k_ref)                                      # (H, S,  dh) bf16
    v = split_heads(v_ref)                                      # (H, S,  dh) bf16

    # scores (scale pre-folded into wq/bq), f32 accumulation
    s = jnp.einsum("hqd,hkd->hqk", q, k,
                   preferred_element_type=jnp.float32)          # (H, tq, S)

    # single-pass softmax (full K resident -> no online rescale needed)
    m = jnp.max(s, axis=-1, keepdims=True)
    p = jnp.exp(s - m)
    l = jnp.sum(p, axis=-1, keepdims=True)

    ctx = jnp.einsum("hqk,hkd->hqd", p.astype(v.dtype), v,
                     preferred_element_type=jnp.float32)        # (H, tq, dh)
    ctx = ctx * pl.reciprocal(l, approx=False)                  # exact, once/q-tile

    # merge heads in-VMEM -> lane-dense (tq, D) store
    merged = jnp.concatenate([ctx[h] for h in range(H)], axis=-1)
    o_ref[0] = merged.astype(o_ref.dtype)


# ---------------------------------------------------------------------------
# kernel 3: output projection + residual + LN1 + FFN(ReLU) + residual + LN2
# ---------------------------------------------------------------------------
def out_ffn_kernel(x_ref, ctx_ref, wo_ref, bo_ref, g1_ref, be1_ref,
                   w1_ref, b1_ref, w2_ref, b2_ref, g2_ref, be2_ref,
                   out_ref, *, eps):
    x = x_ref[...]                                              # (tr, D) f32
    ctx = ctx_ref[...]                                          # (tr, D) bf16

    attn = jnp.dot(ctx, wo_ref[...],
                   preferred_element_type=jnp.float32) + bo_ref[...]

    # dropout1 -> identity (eval)
    h1 = x + attn
    mu1 = jnp.mean(h1, axis=-1, keepdims=True)
    c1 = h1 - mu1
    var1 = jnp.mean(c1 * c1, axis=-1, keepdims=True)            # two-pass var
    x1 = c1 * jax.lax.rsqrt(var1 + eps) * g1_ref[...] + be1_ref[...]

    ff = jnp.dot(x1.astype(jnp.bfloat16), w1_ref[...],
                 preferred_element_type=jnp.float32) + b1_ref[...]
    ff = jnp.maximum(ff, 0.0)
    ff = jnp.dot(ff.astype(jnp.bfloat16), w2_ref[...],
                 preferred_element_type=jnp.float32) + b2_ref[...]

    # dropout2 -> identity (eval)
    h2 = x1 + ff
    mu2 = jnp.mean(h2, axis=-1, keepdims=True)
    c2 = h2 - mu2
    var2 = jnp.mean(c2 * c2, axis=-1, keepdims=True)            # two-pass var
    out_ref[...] = (c2 * jax.lax.rsqrt(var2 + eps)
                    * g2_ref[...] + be2_ref[...]).astype(out_ref.dtype)


# ---------------------------------------------------------------------------
# wrapper
# ---------------------------------------------------------------------------
def boring_gpt_block(x, params, num_heads, attn_mask=None):
    if attn_mask is not None:
        raise NotImplementedError("TODO(synk): attn_mask path not implemented")

    B, S, D = x.shape
    H = num_heads
    dh = D // H
    d_ff = params["w1"].shape[1]
    bf16, f32 = jnp.bfloat16, jnp.float32

    # parameter prep (one-time layout plumbing outside the kernels);
    # fold 1/sqrt(dh) into the Q projection.
    scale = 1.0 / math.sqrt(dh)
    wqkv = jnp.concatenate([params["wq"] * scale, params["wk"], params["wv"]],
                           axis=1).astype(bf16)                  # (D, 3D)
    bqkv = jnp.concatenate([params["bq"] * scale, params["bk"], params["bv"]],
                           axis=1).astype(f32)                   # (1, 3D)
    wo = params["wo"].astype(bf16)
    w1 = params["w1"].astype(bf16)
    w2 = params["w2"].astype(bf16)

    rows = B * S
    # cap row tile so the parallel axis has >= 2 iterations (v7x: 2 TCs)
    tr = _pick_tile(rows, target=min(256, max(8, rows // 2)))
    x2d = x.reshape(rows, D)

    # ----------------- kernel 1: fused QKV projection -----------------
    qkv = pl.pallas_call(
        qkv_proj_kernel,
        out_shape=jax.ShapeDtypeStruct((rows, 3 * D), bf16),
        grid_spec=pltpu.PrefetchScalarGridSpec(
            num_scalar_prefetch=0,
            grid=(rows // tr,),
            in_specs=[
                pl.BlockSpec((tr, D), lambda r: (r, 0)),
                _const_spec((D, 3 * D)),                         # wqkv, single-buffered
                _const_spec((1, 3 * D)),                         # bqkv, single-buffered
            ],
            out_specs=pl.BlockSpec((tr, 3 * D), lambda r: (r, 0)),
        ),
        compiler_params=pltpu.CompilerParams(
            dimension_semantics=("parallel",),
            vmem_limit_bytes=_vmem_limit_bytes(
                ((tr, D), f32), ((D, 3 * D), bf16),
                ((1, 3 * D), f32), ((tr, 3 * D), bf16)),
        ),
    )(x2d, wqkv, bqkv)

    # free reshape only (no transpose): (B*S, 3D) -> (B, S, 3D)
    qkv3 = qkv.reshape(B, S, 3 * D)

    # ----------------- kernel 2: attention (full K/V per q-tile) -----------------
    tq_target = 128 if "v5" in _device_kind() else 256
    if B == 1:
        tq_target = min(tq_target, max(8, S // 2))               # keep >=2 parallel iters
    tq = _pick_tile(S, target=tq_target)

    # K/V must fit VMEM for this single-pass path (trivially true at these sizes)
    kv_resident = 2 * 2 * S * D * jnp.dtype(bf16).itemsize       # dbl-buffered K + V
    if kv_resident > 0.5 * _tpu_vmem_capacity_bytes():
        raise NotImplementedError("TODO(synk): streaming-KV path for long sequences")

    ctx = pl.pallas_call(
        functools.partial(attn_kernel, num_heads=H, head_dim=dh),
        out_shape=jax.ShapeDtypeStruct((B, S, D), bf16),
        grid_spec=pltpu.PrefetchScalarGridSpec(
            num_scalar_prefetch=0,
            grid=(B, S // tq),
            in_specs=[
                pl.BlockSpec((1, tq, D), lambda b, qi: (b, qi, 0)),   # Q rows
                pl.BlockSpec((1, S, D), lambda b, qi: (b, 0, 1)),     # full K
                pl.BlockSpec((1, S, D), lambda b, qi: (b, 0, 2)),     # full V
            ],
            out_specs=pl.BlockSpec((1, tq, D), lambda b, qi: (b, qi, 0)),  # lane-dense
        ),
        compiler_params=pltpu.CompilerParams(
            dimension_semantics=("parallel", "parallel"),
            vmem_limit_bytes=_vmem_limit_bytes(
                ((1, tq, D), bf16), ((1, S, D), bf16), ((1, S, D), bf16),
                ((1, tq, D), bf16),
                ((H, tq, S), f32), ((H, tq, S), f32), ((H, tq, dh), f32)),
        ),
    )(qkv3, qkv3, qkv3)

    # free reshape only (heads already merged lane-dense in-kernel)
    ctx2d = ctx.reshape(rows, D)

    # ------- kernel 3: o-proj + residual + LN1 + FFN + residual + LN2 -------
    out2d = pl.pallas_call(
        functools.partial(out_ffn_kernel, eps=1e-5),
        out_shape=jax.ShapeDtypeStruct((rows, D), f32),
        grid_spec=pltpu.PrefetchScalarGridSpec(
            num_scalar_prefetch=0,
            grid=(rows // tr,),
            in_specs=[
                pl.BlockSpec((tr, D), lambda r: (r, 0)),         # x (residual)
                pl.BlockSpec((tr, D), lambda r: (r, 0)),         # ctx
                _const_spec((D, D)),                             # wo
                _const_spec((1, D)),                             # bo
                _const_spec((1, D)),                             # g1
                _const_spec((1, D)),                             # be1
                _const_spec((D, d_ff)),                          # w1
                _const_spec((1, d_ff)),                          # b1
                _const_spec((d_ff, D)),                          # w2
                _const_spec((1, D)),                             # b2
                _const_spec((1, D)),                             # g2
                _const_spec((1, D)),                             # be2
            ],
            out_specs=pl.BlockSpec((tr, D), lambda r: (r, 0)),
        ),
        compiler_params=pltpu.CompilerParams(
            dimension_semantics=("parallel",),
            vmem_limit_bytes=_vmem_limit_bytes(
                ((tr, D), f32), ((tr, D), bf16), ((D, D), bf16),
                ((D, d_ff), bf16), ((d_ff, D), bf16),
                ((tr, d_ff), f32), ((tr, D), f32)),
        ),
    )(x2d, ctx2d,
      wo, params["bo"], params["g1"], params["be1"],
      w1, params["b1"], w2, params["b2"], params["g2"], params["be2"])

    return out2d.reshape(B, S, D)


# ---------------------------------------------------------------------------
# params + pure-JAX reference
# ---------------------------------------------------------------------------
def init_params(key, d_model, d_ff):
    ks = jax.random.split(key, 12)
    s_d = 1.0 / math.sqrt(d_model)
    s_f = 1.0 / math.sqrt(d_ff)

    def lw(k, fi, fo, s):
        return jax.random.uniform(k, (fi, fo), jnp.float32, -s, s)

    def lb(k, fo, s):
        return jax.random.uniform(k, (1, fo), jnp.float32, -s, s)

    return {
        "wq": lw(ks[0], d_model, d_model, s_d), "bq": lb(ks[1], d_model, s_d),
        "wk": lw(ks[2], d_model, d_model, s_d), "bk": lb(ks[3], d_model, s_d),
        "wv": lw(ks[4], d_model, d_model, s_d), "bv": lb(ks[5], d_model, s_d),
        "wo": lw(ks[6], d_model, d_model, s_d), "bo": lb(ks[7], d_model, s_d),
        "g1": jnp.ones((1, d_model), jnp.float32),
        "be1": jnp.zeros((1, d_model), jnp.float32),
        "w1": lw(ks[8], d_model, d_ff, s_d), "b1": lb(ks[9], d_ff, s_d),
        "w2": lw(ks[10], d_ff, d_model, s_f), "b2": lb(ks[11], d_model, s_f),
        "g2": jnp.ones((1, d_model), jnp.float32),
        "be2": jnp.zeros((1, d_model), jnp.float32),
    }


def reference(x, p, num_heads):
    B, S, D = x.shape
    dh = D // num_heads
    q = x @ p["wq"] + p["bq"]
    k = x @ p["wk"] + p["bk"]
    v = x @ p["wv"] + p["bv"]
    q = q.reshape(B, S, num_heads, dh).transpose(0, 2, 1, 3)
    k = k.reshape(B, S, num_heads, dh).transpose(0, 2, 1, 3)
    v = v.reshape(B, S, num_heads, dh).transpose(0, 2, 1, 3)
    s = jnp.einsum("bhqd,bhkd->bhqk", q, k) / math.sqrt(dh)
    pattn = jax.nn.softmax(s, axis=-1)
    a = jnp.einsum("bhqk,bhkd->bhqd", pattn, v).transpose(0, 2, 1, 3).reshape(B, S, D)
    a = a @ p["wo"] + p["bo"]
    h1 = x + a
    x1 = (h1 - h1.mean(-1, keepdims=True)) / jnp.sqrt(h1.var(-1, keepdims=True) + 1e-5)
    x1 = x1 * p["g1"] + p["be1"]
    ff = jnp.maximum(x1 @ p["w1"] + p["b1"], 0.0) @ p["w2"] + p["b2"]
    h2 = x1 + ff
    x2 = (h2 - h2.mean(-1, keepdims=True)) / jnp.sqrt(h2.var(-1, keepdims=True) + 1e-5)
    return x2 * p["g2"] + p["be2"]


if __name__ == "__main__":
    d_model, num_heads, d_ff = 128, 4, 256
    B, S = 2, 16

    key = jax.random.PRNGKey(0)
    kx, kp = jax.random.split(key)
    x = jax.random.normal(kx, (B, S, d_model), jnp.float32)
    params = init_params(kp, d_model, d_ff)

    fwd = jax.jit(functools.partial(boring_gpt_block, num_heads=num_heads))
    out = jax.block_until_ready(fwd(x, params))

    ref = reference(x, params, num_heads)
    assert out.shape == (B, S, d_model)
    # bf16 matmuls with f32 accumulation -> compare against f32 ref loosely
    assert jnp.allclose(out, ref, atol=5e-2, rtol=5e-2), "mismatch vs reference"

    print("KERNEL_OK")
</pallas_src>

<mosaic_0001>
module attributes {stable_mosaic.version = 11 : i64} {
  func.func @qkv_proj_kernel(%arg0: i32, %arg1: memref<16x128xf32, #tpu.memory_space<vmem>>, %arg2: memref<128x384xbf16, #tpu.memory_space<vmem>>, %arg3: memref<1x384xf32, #tpu.memory_space<vmem>>, %arg4: memref<16x384xbf16, #tpu.memory_space<vmem>>) attributes {dimension_semantics = [#tpu.dimension_semantics<parallel>], iteration_bounds = array<i64: 2>, scalar_prefetch = 0 : i64, scratch_operands = 0 : i64, tpu.core_type = #tpu.core_type<tc>, window_params = [{transform_indices = @transform_0, window_bounds = array<i64: 16, 128>}, {pipeline_mode = #tpu.pipeline_mode<synchronous>, transform_indices = @transform_1, window_bounds = array<i64: 128, 384>}, {pipeline_mode = #tpu.pipeline_mode<synchronous>, transform_indices = @transform_2, window_bounds = array<i64: 1, 384>}, {transform_indices = @transform_3, window_bounds = array<i64: 16, 384>}]} {
    %c0 = arith.constant 0 : index
    %c0_0 = arith.constant 0 : index
    %0 = vector.load %arg1[%c0, %c0_0] : memref<16x128xf32, #tpu.memory_space<vmem>>, vector<16x128xf32>
    %1 = arith.truncf %0 : vector<16x128xf32> to vector<16x128xbf16>
    %c0_1 = arith.constant 0 : index
    %c0_2 = arith.constant 0 : index
    %2 = vector.load %arg2[%c0_1, %c0_2] : memref<128x384xbf16, #tpu.memory_space<vmem>>, vector<128x384xbf16>
    %cst = arith.constant dense<0.000000e+00> : vector<16x384xf32>
    %3 = tpu.matmul %1, %2, %cst {dimension_numbers = #tpu.dot_dimension_numbers<[1], [0], [0], [1], [0, 0, 1, 1], [], []>} : vector<16x128xbf16>, vector<128x384xbf16>, vector<16x384xf32> -> vector<16x384xf32>
    %c0_3 = arith.constant 0 : index
    %c0_4 = arith.constant 0 : index
    %4 = vector.load %arg3[%c0_3, %c0_4] : memref<1x384xf32, #tpu.memory_space<vmem>>, vector<1x384xf32>
    %5 = vector.broadcast %4 : vector<1x384xf32> to vector<16x384xf32>
    %6 = arith.addf %3, %5 : vector<16x384xf32>
    %7 = arith.truncf %6 : vector<16x384xf32> to vector<16x384xbf16>
    %c0_5 = arith.constant 0 : index
    %c0_6 = arith.constant 0 : index
    %8 = vector.load %arg4[%c0_5, %c0_6] : memref<16x384xbf16, #tpu.memory_space<vmem>>, vector<16x384xbf16>
    tpu.vector_store %arg4[%c0_5, %c0_6], %7 {strides = array<i32>} : memref<16x384xbf16, #tpu.memory_space<vmem>>, vector<16x384xbf16>,
    return
  }
  func.func @transform_0(%arg0: i32) -> (i32, i32) {
    %c0_i32 = arith.constant 0 : i32
    %c0_i32_0 = arith.constant 0 : i32
    return %arg0, %c0_i32 : i32, i32
  }
  func.func @transform_1(%arg0: i32) -> (i32, i32) {
    %c0_i32 = arith.constant 0 : i32
    %c0_i32_0 = arith.constant 0 : i32
    %c0_i32_1 = arith.constant 0 : i32
    return %c0_i32, %c0_i32_0 : i32, i32
  }
  func.func @transform_2(%arg0: i32) -> (i32, i32) {
    %c0_i32 = arith.constant 0 : i32
    %c0_i32_0 = arith.constant 0 : i32
    %c0_i32_1 = arith.constant 0 : i32
    return %c0_i32, %c0_i32_0 : i32, i32
  }
  func.func @transform_3(%arg0: i32) -> (i32, i32) {
    %c0_i32 = arith.constant 0 : i32
    %c0_i32_0 = arith.constant 0 : i32
    return %arg0, %c0_i32 : i32, i32
  }
}

module attributes {stable_mosaic.version = 11 : i64} {
  func.func @attn_kernel(%arg0: i32, %arg1: i32, %arg2: memref<1x16x128xbf16, #tpu.memory_space<vmem>>, %arg3: memref<1x16x128xbf16, #tpu.memory_space<vmem>>, %arg4: memref<1x16x128xbf16, #tpu.memory_space<vmem>>, %arg5: memref<1x16x128xbf16, #tpu.memory_space<vmem>>) attributes {dimension_semantics = [#tpu.dimension_semantics<parallel>, #tpu.dimension_semantics<parallel>], iteration_bounds = array<i64: 2, 1>, scalar_prefetch = 0 : i64, scratch_operands = 0 : i64, tpu.core_type = #tpu.core_type<tc>, window_params = [{transform_indices = @transform_0, window_bounds = array<i64: 1, 16, 128>}, {transform_indices = @transform_1, window_bounds = array<i64: 1, 16, 128>}, {transform_indices = @transform_2, window_bounds = array<i64: 1, 16, 128>}, {transform_indices = @transform_3, window_bounds = array<i64: 1, 16, 128>}]} {
    %c0 = arith.constant 0 : index
    %c0_0 = arith.constant 0 : index
    %c0_1 = arith.constant 0 : index
    %0 = vector.load %arg2[%c0, %c0_0, %c0_1] : memref<1x16x128xbf16, #tpu.memory_space<vmem>>, vector<1x16x128xbf16>
    %1 = vector.shape_cast %0 : vector<1x16x128xbf16> to vector<16x128xbf16>
    %2 = vector.extract_strided_slice %1 {offsets = [0, 0], sizes = [16, 32], strides = [1, 1]} : vector<16x128xbf16> to vector<16x32xbf16>
    %3 = vector.extract_strided_slice %1 {offsets = [0, 32], sizes = [16, 32], strides = [1, 1]} : vector<16x128xbf16> to vector<16x32xbf16>
    %4 = vector.extract_strided_slice %1 {offsets = [0, 64], sizes = [16, 32], strides = [1, 1]} : vector<16x128xbf16> to vector<16x32xbf16>
    %5 = vector.extract_strided_slice %1 {offsets = [0, 96], sizes = [16, 32], strides = [1, 1]} : vector<16x128xbf16> to vector<16x32xbf16>
    %6 = vector.shape_cast %2 : vector<16x32xbf16> to vector<1x16x32xbf16>
    %7 = vector.shape_cast %3 : vector<16x32xbf16> to vector<1x16x32xbf16>
    %8 = vector.shape_cast %4 : vector<16x32xbf16> to vector<1x16x32xbf16>
    %9 = vector.shape_cast %5 : vector<16x32xbf16> to vector<1x16x32xbf16>
    %10 = tpu.concatenate %6, %7, %8, %9 in 0 : vector<1x16x32xbf16>, vector<1x16x32xbf16>, vector<1x16x32xbf16>, vector<1x16x32xbf16> -> vector<4x16x32xbf16>
    %c0_2 = arith.constant 0 : index
    %c0_3 = arith.constant 0 : index
    %c0_4 = arith.constant 0 : index
    %11 = vector.load %arg3[%c0_2, %c0_3, %c0_4] : memref<1x16x128xbf16, #tpu.memory_space<vmem>>, vector<1x16x128xbf16>
    %12 = vector.shape_cast %11 : vector<1x16x128xbf16> to vector<16x128xbf16>
    %13 = vector.extract_strided_slice %12 {offsets = [0, 0], sizes = [16, 32], strides = [1, 1]} : vector<16x128xbf16> to vector<16x32xbf16>
    %14 = vector.extract_strided_slice %12 {offsets = [0, 32], sizes = [16, 32], strides = [1, 1]} : vector<16x128xbf16> to vector<16x32xbf16>
    %15 = vector.extract_strided_slice %12 {offsets = [0, 64], sizes = [16, 32], strides = [1, 1]} : vector<16x128xbf16> to vector<16x32xbf16>
    %16 = vector.extract_strided_slice %12 {offsets = [0, 96], sizes = [16, 32], strides = [1, 1]} : vector<16x128xbf16> to vector<16x32xbf16>
    %17 = vector.shape_cast %13 : vector<16x32xbf16> to vector<1x16x32xbf16>
    %18 = vector.shape_cast %14 : vector<16x32xbf16> to vector<1x16x32xbf16>
    %19 = vector.shape_cast %15 : vector<16x32xbf16> to vector<1x16x32xbf16>
    %20 = vector.shape_cast %16 : vector<16x32xbf16> to vector<1x16x32xbf16>
    %21 = tpu.concatenate %17, %18, %19, %20 in 0 : vector<1x16x32xbf16>, vector<1x16x32xbf16>, vector<1x16x32xbf16>, vector<1x16x32xbf16> -> vector<4x16x32xbf16>
    %c0_5 = arith.constant 0 : index
    %c0_6 = arith.constant 0 : index
    %c0_7 = arith.constant 0 : index
    %22 = vector.load %arg4[%c0_5, %c0_6, %c0_7] : memref<1x16x128xbf16, #tpu.memory_space<vmem>>, vector<1x16x128xbf16>
    %23 = vector.shape_cast %22 : vector<1x16x128xbf16> to vector<16x128xbf16>
    %24 = vector.extract_strided_slice %23 {offsets = [0, 0], sizes = [16, 32], strides = [1, 1]} : vector<16x128xbf16> to vector<16x32xbf16>
    %25 = vector.extract_strided_slice %23 {offsets = [0, 32], sizes = [16, 32], strides = [1, 1]} : vector<16x128xbf16> to vector<16x32xbf16>
    %26 = vector.extract_strided_slice %23 {offsets = [0, 64], sizes = [16, 32], strides = [1, 1]} : vector<16x128xbf16> to vector<16x32xbf16>
    %27 = vector.extract_strided_slice %23 {offsets = [0, 96], sizes = [16, 32], strides = [1, 1]} : vector<16x128xbf16> to vector<16x32xbf16>
    %28 = vector.shape_cast %24 : vector<16x32xbf16> to vector<1x16x32xbf16>
    %29 = vector.shape_cast %25 : vector<16x32xbf16> to vector<1x16x32xbf16>
    %30 = vector.shape_cast %26 : vector<16x32xbf16> to vector<1x16x32xbf16>
    %31 = vector.shape_cast %27 : vector<16x32xbf16> to vector<1x16x32xbf16>
    %32 = tpu.concatenate %28, %29, %30, %31 in 0 : vector<1x16x32xbf16>, vector<1x16x32xbf16>, vector<1x16x32xbf16>, vector<1x16x32xbf16> -> vector<4x16x32xbf16>
    "tpu.trace_start"() <{level = 10 : i32, message = "hqd,hkd->hqk"}> : () -> ()
    %cst = arith.constant dense<0.000000e+00> : vector<4x16x16xf32>
    %33 = tpu.matmul %10, %21, %cst {dimension_numbers = #tpu.dot_dimension_numbers<[2], [2], [1], [1], [0, 0, 0, 1, 1, 1], [0], [0]>} : vector<4x16x32xbf16>, vector<4x16x32xbf16>, vector<4x16x16xf32> -> vector<4x16x16xf32>
    "tpu.trace_stop"() : () -> ()
    %cst_8 = arith.constant dense<0xFF800000> : vector<4x16xf32>
    %34 = vector.multi_reduction <maximumf>, %33, %cst_8 [2] : vector<4x16x16xf32> to vector<4x16xf32>
    %35 = vector.shape_cast %34 : vector<4x16xf32> to vector<4x16x1xf32>
    %36 = vector.broadcast %35 : vector<4x16x1xf32> to vector<4x16x16xf32>
    %37 = arith.subf %33, %36 : vector<4x16x16xf32>
    %38 = math.exp %37 : vector<4x16x16xf32>
    %cst_9 = arith.constant dense<0.000000e+00> : vector<4x16xf32>
    %39 = vector.multi_reduction <add>, %38, %cst_9 [2] : vector<4x16x16xf32> to vector<4x16xf32>
    %40 = vector.shape_cast %39 : vector<4x16xf32> to vector<4x16x1xf32>
    %41 = arith.truncf %38 : vector<4x16x16xf32> to vector<4x16x16xbf16>
    "tpu.trace_start"() <{level = 10 : i32, message = "hqk,hkd->hqd"}> : () -> ()
    %cst_10 = arith.constant dense<0.000000e+00> : vector<4x16x32xf32>
    %42 = tpu.matmul %41, %32, %cst_10 {dimension_numbers = #tpu.dot_dimension_numbers<[2], [1], [1], [2], [0, 0, 0, 1, 1, 2], [0], [0]>} : vector<4x16x16xbf16>, vector<4x16x32xbf16>, vector<4x16x32xf32> -> vector<4x16x32xf32>
    "tpu.trace_stop"() : () -> ()
    %43 = tpu.reciprocal %40 : vector<4x16x1xf32> -> vector<4x16x1xf32>
    %44 = vector.broadcast %43 : vector<4x16x1xf32> to vector<4x16x32xf32>
    %45 = arith.mulf %42, %44 : vector<4x16x32xf32>
    %46 = vector.extract_strided_slice %45 {offsets = [0, 0, 0], sizes = [1, 16, 32], strides = [1, 1, 1]} : vector<4x16x32xf32> to vector<1x16x32xf32>
    %47 = vector.shape_cast %46 : vector<1x16x32xf32> to vector<16x32xf32>
    %48 = vector.extract_strided_slice %45 {offsets = [1, 0, 0], sizes = [1, 16, 32], strides = [1, 1, 1]} : vector<4x16x32xf32> to vector<1x16x32xf32>
    %49 = vector.shape_cast %48 : vector<1x16x32xf32> to vector<16x32xf32>
    %50 = vector.extract_strided_slice %45 {offsets = [2, 0, 0], sizes = [1, 16, 32], strides = [1, 1, 1]} : vector<4x16x32xf32> to vector<1x16x32xf32>
    %51 = vector.shape_cast %50 : vector<1x16x32xf32> to vector<16x32xf32>
    %52 = vector.extract_strided_slice %45 {offsets = [3, 0, 0], sizes = [1, 16, 32], strides = [1, 1, 1]} : vector<4x16x32xf32> to vector<1x16x32xf32>
    %53 = vector.shape_cast %52 : vector<1x16x32xf32> to vector<16x32xf32>
    %54 = tpu.concatenate %47, %49, %51, %53 in 1 : vector<16x32xf32>, vector<16x32xf32>, vector<16x32xf32>, vector<16x32xf32> -> vector<16x128xf32>
    %55 = arith.truncf %54 : vector<16x128xf32> to vector<16x128xbf16>
    %c0_11 = arith.constant 0 : index
    %c0_12 = arith.constant 0 : index
    %c0_13 = arith.constant 0 : index
    %56 = vector.load %arg5[%c0_11, %c0_12, %c0_13] : memref<1x16x128xbf16, #tpu.memory_space<vmem>>, vector<1x16x128xbf16>
    %57 = vector.shape_cast %56 : vector<1x16x128xbf16> to vector<16x128xbf16>
    %58 = vector.shape_cast %55 : vector<16x128xbf16> to vector<1x16x128xbf16>
    tpu.vector_store %arg5[%c0_11, %c0_12, %c0_13], %58 {strides = array<i32>} : memref<1x16x128xbf16, #tpu.memory_space<vmem>>, vector<1x16x128xbf16>,
    return
  }
  func.func @transform_0(%arg0: i32, %arg1: i32) -> (i32, i32, i32) {
    %c0_i32 = arith.constant 0 : i32
    %c0_i32_0 = arith.constant 0 : i32
    return %arg0, %arg1, %c0_i32 : i32, i32, i32
  }
  func.func @transform_1(%arg0: i32, %arg1: i32) -> (i32, i32, i32) {
    %c0_i32 = arith.constant 0 : i32
    %c1_i32 = arith.constant 1 : i32
    %c0_i32_0 = arith.constant 0 : i32
    return %arg0, %c0_i32, %c1_i32 : i32, i32, i32
  }
  func.func @transform_2(%arg0: i32, %arg1: i32) -> (i32, i32, i32) {
    %c0_i32 = arith.constant 0 : i32
    %c2_i32 = arith.constant 2 : i32
    %c0_i32_0 = arith.constant 0 : i32
    return %arg0, %c0_i32, %c2_i32 : i32, i32, i32
  }
  func.func @transform_3(%arg0: i32, %arg1: i32) -> (i32, i32, i32) {
    %c0_i32 = arith.constant 0 : i32
    %c0_i32_0 = arith.constant 0 : i32
    return %arg0, %arg1, %c0_i32 : i32, i32, i32
  }
}

module attributes {stable_mosaic.version = 11 : i64} {
  func.func @out_ffn_kernel(%arg0: i32, %arg1: memref<16x128xf32, #tpu.memory_space<vmem>>, %arg2: memref<16x128xbf16, #tpu.memory_space<vmem>>, %arg3: memref<128x128xbf16, #tpu.memory_space<vmem>>, %arg4: memref<1x128xf32, #tpu.memory_space<vmem>>, %arg5: memref<1x128xf32, #tpu.memory_space<vmem>>, %arg6: memref<1x128xf32, #tpu.memory_space<vmem>>, %arg7: memref<128x256xbf16, #tpu.memory_space<vmem>>, %arg8: memref<1x256xf32, #tpu.memory_space<vmem>>, %arg9: memref<256x128xbf16, #tpu.memory_space<vmem>>, %arg10: memref<1x128xf32, #tpu.memory_space<vmem>>, %arg11: memref<1x128xf32, #tpu.memory_space<vmem>>, %arg12: memref<1x128xf32, #tpu.memory_space<vmem>>, %arg13: memref<16x128xf32, #tpu.memory_space<vmem>>) attributes {dimension_semantics = [#tpu.dimension_semantics<parallel>], iteration_bounds = array<i64: 2>, scalar_prefetch = 0 : i64, scratch_operands = 0 : i64, tpu.core_type = #tpu.core_type<tc>, window_params = [{transform_indices = @transform_0, window_bounds = array<i64: 16, 128>}, {transform_indices = @transform_1, window_bounds = array<i64: 16, 128>}, {pipeline_mode = #tpu.pipeline_mode<synchronous>, transform_indices = @transform_2, window_bounds = array<i64: 128, 128>}, {pipeline_mode = #tpu.pipeline_mode<synchronous>, transform_indices = @transform_3, window_bounds = array<i64: 1, 128>}, {pipeline_mode = #tpu.pipeline_mode<synchronous>, transform_indices = @transform_4, window_bounds = array<i64: 1, 128>}, {pipeline_mode = #tpu.pipeline_mode<synchronous>, transform_indices = @transform_5, window_bounds = array<i64: 1, 128>}, {pipeline_mode = #tpu.pipeline_mode<synchronous>, transform_indices = @transform_6, window_bounds = array<i64: 128, 256>}, {pipeline_mode = #tpu.pipeline_mode<synchronous>, transform_indices = @transform_7, window_bounds = array<i64: 1, 256>}, {pipeline_mode = #tpu.pipeline_mode<synchronous>, transform_indices = @transform_8, window_bounds = array<i64: 256, 128>}, {pipeline_mode = #tpu.pipeline_mode<synchronous>, transform_indices = @transform_9, window_bounds = array<i64: 1, 128>}, {pipeline_mode = #tpu.pipeline_mode<synchronous>, transform_indices = @transform_10, window_bounds = array<i64: 1, 128>}, {pipeline_mode = #tpu.pipeline_mode<synchronous>, transform_indices = @transform_11, window_bounds = array<i64: 1, 128>}, {transform_indices = @transform_12, window_bounds = array<i64: 16, 128>}]} {
    %c0 = arith.constant 0 : index
    %c0_0 = arith.constant 0 : index
    %0 = vector.load %arg1[%c0, %c0_0] : memref<16x128xf32, #tpu.memory_space<vmem>>, vector<16x128xf32>
    %c0_1 = arith.constant 0 : index
    %c0_2 = arith.constant 0 : index
    %1 = vector.load %arg2[%c0_1, %c0_2] : memref<16x128xbf16, #tpu.memory_space<vmem>>, vector<16x128xbf16>
    %c0_3 = arith.constant 0 : index
    %c0_4 = arith.constant 0 : index
    %2 = vector.load %arg3[%c0_3, %c0_4] : memref<128x128xbf16, #tpu.memory_space<vmem>>, vector<128x128xbf16>
    %cst = arith.constant dense<0.000000e+00> : vector<16x128xf32>
    %3 = tpu.matmul %1, %2, %cst {dimension_numbers = #tpu.dot_dimension_numbers<[1], [0], [0], [1], [0, 0, 1, 1], [], []>} : vector<16x128xbf16>, vector<128x128xbf16>, vector<16x128xf32> -> vector<16x128xf32>
    %c0_5 = arith.constant 0 : index
    %c0_6 = arith.constant 0 : index
    %4 = vector.load %arg4[%c0_5, %c0_6] : memref<1x128xf32, #tpu.memory_space<vmem>>, vector<1x128xf32>
    %5 = vector.broadcast %4 : vector<1x128xf32> to vector<16x128xf32>
    %6 = arith.addf %3, %5 : vector<16x128xf32>
    %7 = arith.addf %0, %6 : vector<16x128xf32>
    %cst_7 = arith.constant dense<0.000000e+00> : vector<16xf32>
    %8 = vector.multi_reduction <add>, %7, %cst_7 [1] : vector<16x128xf32> to vector<16xf32>
    %9 = vector.shape_cast %8 : vector<16xf32> to vector<16x1xf32>
    %cst_8 = arith.constant 1.280000e+02 : f32
    %10 = vector.broadcast %cst_8 : f32 to vector<16x1xf32>
    %11 = arith.divf %9, %10 : vector<16x1xf32>
    %12 = vector.broadcast %11 : vector<16x1xf32> to vector<16x128xf32>
    %13 = arith.subf %7, %12 : vector<16x128xf32>
    %14 = arith.mulf %13, %13 : vector<16x128xf32>
    %cst_9 = arith.constant dense<0.000000e+00> : vector<16xf32>
    %15 = vector.multi_reduction <add>, %14, %cst_9 [1] : vector<16x128xf32> to vector<16xf32>
    %16 = vector.shape_cast %15 : vector<16xf32> to vector<16x1xf32>
    %cst_10 = arith.constant 1.280000e+02 : f32
    %17 = vector.broadcast %cst_10 : f32 to vector<16x1xf32>
    %18 = arith.divf %16, %17 : vector<16x1xf32>
    %cst_11 = arith.constant 9.99999974E-6 : f32
    %19 = vector.broadcast %cst_11 : f32 to vector<16x1xf32>
    %20 = arith.addf %18, %19 : vector<16x1xf32>
    %21 = math.rsqrt %20 : vector<16x1xf32>
    %22 = vector.broadcast %21 : vector<16x1xf32> to vector<16x128xf32>
    %23 = arith.mulf %13, %22 : vector<16x128xf32>
    %c0_12 = arith.constant 0 : index
    %c0_13 = arith.constant 0 : index
    %24 = vector.load %arg5[%c0_12, %c0_13] : memref<1x128xf32, #tpu.memory_space<vmem>>, vector<1x128xf32>
    %25 = vector.broadcast %24 : vector<1x128xf32> to vector<16x128xf32>
    %26 = arith.mulf %23, %25 : vector<16x128xf32>
    %c0_14 = arith.constant 0 : index
    %c0_15 = arith.constant 0 : index
    %27 = vector.load %arg6[%c0_14, %c0_15] : memref<1x128xf32, #tpu.memory_space<vmem>>, vector<1x128xf32>
    %28 = vector.broadcast %27 : vector<1x128xf32> to vector<16x128xf32>
    %29 = arith.addf %26, %28 : vector<16x128xf32>
    %30 = arith.truncf %29 : vector<16x128xf32> to vector<16x128xbf16>
    %c0_16 = arith.constant 0 : index
    %c0_17 = arith.constant 0 : index
    %31 = vector.load %arg7[%c0_16, %c0_17] : memref<128x256xbf16, #tpu.memory_space<vmem>>, vector<128x256xbf16>
    %cst_18 = arith.constant dense<0.000000e+00> : vector<16x256xf32>
    %32 = tpu.matmul %30, %31, %cst_18 {dimension_numbers = #tpu.dot_dimension_numbers<[1], [0], [0], [1], [0, 0, 1, 1], [], []>} : vector<16x128xbf16>, vector<128x256xbf16>, vector<16x256xf32> -> vector<16x256xf32>
    %c0_19 = arith.constant 0 : index
    %c0_20 = arith.constant 0 : index
    %33 = vector.load %arg8[%c0_19, %c0_20] : memref<1x256xf32, #tpu.memory_space<vmem>>, vector<1x256xf32>
    %34 = vector.broadcast %33 : vector<1x256xf32> to vector<16x256xf32>
    %35 = arith.addf %32, %34 : vector<16x256xf32>
    %cst_21 = arith.constant 0.000000e+00 : f32
    %36 = vector.broadcast %cst_21 : f32 to vector<16x256xf32>
    %37 = arith.maximumf %35, %36 : vector<16x256xf32>
    %38 = arith.truncf %37 : vector<16x256xf32> to vector<16x256xbf16>
    %c0_22 = arith.constant 0 : index
    %c0_23 = arith.constant 0 : index
    %39 = vector.load %arg9[%c0_22, %c0_23] : memref<256x128xbf16, #tpu.memory_space<vmem>>, vector<256x128xbf16>
    %cst_24 = arith.constant dense<0.000000e+00> : vector<16x128xf32>
    %40 = tpu.matmul %38, %39, %cst_24 {dimension_numbers = #tpu.dot_dimension_numbers<[1], [0], [0], [1], [0, 0, 1, 1], [], []>} : vector<16x256xbf16>, vector<256x128xbf16>, vector<16x128xf32> -> vector<16x128xf32>
    %c0_25 = arith.constant 0 : index
    %c0_26 = arith.constant 0 : index
    %41 = vector.load %arg10[%c0_25, %c0_26] : memref<1x128xf32, #tpu.memory_space<vmem>>, vector<1x128xf32>
    %42 = vector.broadcast %41 : vector<1x128xf32> to vector<16x128xf32>
    %43 = arith.addf %40, %42 : vector<16x128xf32>
    %44 = arith.addf %29, %43 : vector<16x128xf32>
    %cst_27 = arith.constant dense<0.000000e+00> : vector<16xf32>
    %45 = vector.multi_reduction <add>, %44, %cst_27 [1] : vector<16x128xf32> to vector<16xf32>
    %46 = vector.shape_cast %45 : vector<16xf32> to vector<16x1xf32>
    %cst_28 = arith.constant 1.280000e+02 : f32
    %47 = vector.broadcast %cst_28 : f32 to vector<16x1xf32>
    %48 = arith.divf %46, %47 : vector<16x1xf32>
    %49 = vector.broadcast %48 : vector<16x1xf32> to vector<16x128xf32>
    %50 = arith.subf %44, %49 : vector<16x128xf32>
    %51 = arith.mulf %50, %50 : vector<16x128xf32>
    %cst_29 = arith.constant dense<0.000000e+00> : vector<16xf32>
    %52 = vector.multi_reduction <add>, %51, %cst_29 [1] : vector<16x128xf32> to vector<16xf32>
    %53 = vector.shape_cast %52 : vector<16xf32> to vector<16x1xf32>
    %cst_30 = arith.constant 1.280000e+02 : f32
    %54 = vector.broadcast %cst_30 : f32 to vector<16x1xf32>
    %55 = arith.divf %53, %54 : vector<16x1xf32>
    %cst_31 = arith.constant 9.99999974E-6 : f32
    %56 = vector.broadcast %cst_31 : f32 to vector<16x1xf32>
    %57 = arith.addf %55, %56 : vector<16x1xf32>
    %58 = math.rsqrt %57 : vector<16x1xf32>
    %59 = vector.broadcast %58 : vector<16x1xf32> to vector<16x128xf32>
    %60 = arith.mulf %50, %59 : vector<16x128xf32>
    %c0_32 = arith.constant 0 : index
    %c0_33 = arith.constant 0 : index
    %61 = vector.load %arg11[%c0_32, %c0_33] : memref<1x128xf32, #tpu.memory_space<vmem>>, vector<1x128xf32>
    %62 = vector.broadcast %61 : vector<1x128xf32> to vector<16x128xf32>
    %63 = arith.mulf %60, %62 : vector<16x128xf32>
    %c0_34 = arith.constant 0 : index
    %c0_35 = arith.constant 0 : index
    %64 = vector.load %arg12[%c0_34, %c0_35] : memref<1x128xf32, #tpu.memory_space<vmem>>, vector<1x128xf32>
    %65 = vector.broadcast %64 : vector<1x128xf32> to vector<16x128xf32>
    %66 = arith.addf %63, %65 : vector<16x128xf32>
    %c0_36 = arith.constant 0 : index
    %c0_37 = arith.constant 0 : index
    %67 = vector.load %arg13[%c0_36, %c0_37] : memref<16x128xf32, #tpu.memory_space<vmem>>, vector<16x128xf32>
    tpu.vector_store %arg13[%c0_36, %c0_37], %66 {strides = array<i32>} : memref<16x128xf32, #tpu.memory_space<vmem>>, vector<16x128xf32>,
    return
  }
  func.func @transform_0(%arg0: i32) -> (i32, i32) {
    %c0_i32 = arith.constant 0 : i32
    %c0_i32_0 = arith.constant 0 : i32
    return %arg0, %c0_i32 : i32, i32
  }
  func.func @transform_1(%arg0: i32) -> (i32, i32) {
    %c0_i32 = arith.constant 0 : i32
    %c0_i32_0 = arith.constant 0 : i32
    return %arg0, %c0_i32 : i32, i32
  }
  func.func @transform_2(%arg0: i32) -> (i32, i32) {
    %c0_i32 = arith.constant 0 : i32
    %c0_i32_0 = arith.constant 0 : i32
    %c0_i32_1 = arith.constant 0 : i32
    return %c0_i32, %c0_i32_0 : i32, i32
  }
  func.func @transform_3(%arg0: i32) -> (i32, i32) {
    %c0_i32 = arith.constant 0 : i32
    %c0_i32_0 = arith.constant 0 : i32
    %c0_i32_1 = arith.constant 0 : i32
    return %c0_i32, %c0_i32_0 : i32, i32
  }
  func.func @transform_4(%arg0: i32) -> (i32, i32) {
    %c0_i32 = arith.constant 0 : i32
    %c0_i32_0 = arith.constant 0 : i32
    %c0_i32_1 = arith.constant 0 : i32
    return %c0_i32, %c0_i32_0 : i32, i32
  }
  func.func @transform_5(%arg0: i32) -> (i32, i32) {
    %c0_i32 = arith.constant 0 : i32
    %c0_i32_0 = arith.constant 0 : i32
    %c0_i32_1 = arith.constant 0 : i32
    return %c0_i32, %c0_i32_0 : i32, i32
  }
  func.func @transform_6(%arg0: i32) -> (i32, i32) {
    %c0_i32 = arith.constant 0 : i32
    %c0_i32_0 = arith.constant 0 : i32
    %c0_i32_1 = arith.constant 0 : i32
    return %c0_i32, %c0_i32_0 : i32, i32
  }
  func.func @transform_7(%arg0: i32) -> (i32, i32) {
    %c0_i32 = arith.constant 0 : i32
    %c0_i32_0 = arith.constant 0 : i32
    %c0_i32_1 = arith.constant 0 : i32
    return %c0_i32, %c0_i32_0 : i32, i32
  }
  func.func @transform_8(%arg0: i32) -> (i32, i32) {
    %c0_i32 = arith.constant 0 : i32
    %c0_i32_0 = arith.constant 0 : i32
    %c0_i32_1 = arith.constant 0 : i32
    return %c0_i32, %c0_i32_0 : i32, i32
  }
  func.func @transform_9(%arg0: i32) -> (i32, i32) {
    %c0_i32 = arith.constant 0 : i32
    %c0_i32_0 = arith.constant 0 : i32
    %c0_i32_1 = arith.constant 0 : i32
    return %c0_i32, %c0_i32_0 : i32, i32
  }
  func.func @transform_10(%arg0: i32) -> (i32, i32) {
    %c0_i32 = arith.constant 0 : i32
    %c0_i32_0 = arith.constant 0 : i32
    %c0_i32_1 = arith.constant 0 : i32
    return %c0_i32, %c0_i32_0 : i32, i32
  }
  func.func @transform_11(%arg0: i32) -> (i32, i32) {
    %c0_i32 = arith.constant 0 : i32
    %c0_i32_0 = arith.constant 0 : i32
    %c0_i32_1 = arith.constant 0 : i32
    return %c0_i32, %c0_i32_0 : i32, i32
  }
  func.func @transform_12(%arg0: i32) -> (i32, i32) {
    %c0_i32 = arith.constant 0 : i32
    %c0_i32_0 = arith.constant 0 : i32
    return %arg0, %c0_i32 : i32, i32
  }
}

</mosaic_0001>

<bundles_post_ra>
// kernel: boring_gpt_block.3
= control target key start
LH: loop header
LB: loop body
LE: loop exit
PB: predicated region body
PF: predicated region fallthrough
CT: control target
= control target key end

     0   :  { %s670_s12 = smov 0   ;;  %s768_s0 = inlined_call_operand.vmem [shape: f32[32,128], index: 0, kind: input, shape index: {}]   ;;  %s769_s1 = inlined_call_operand.vmem [shape: bf16[128,384], index: 1, kind: input, shape index: {}]   ;;  %s770_s2 = inlined_call_operand.vmem [shape: f32[1,384], index: 2, kind: input, shape index: {}]   ;;  %s771_s3 = inlined_call_operand.vmem [shape: bf16[32,384], index: 3, kind: output, shape index: {}]  }
   0x1 LB: > { %s523_s13 = sadd.s32 4294967295, %s645_s12   ;;  %p527_p0 = scmp.ge.s32.totalorder %s645_s12, 1  ;;  %s645_s12 = sphi %s670_s12, %s13_s12  }
   0x2   : > { %p138_p1 = scmp.lt.s32.totalorder %s645_s12, 3 }
   0x4   : > { %p139_p2 = pnand %p527_p0, %p138_p1 }
   0x5   : > { %s528_s7 = sshll.u32 (!%p139_p2), %s523_s13, 1 }
   0x6   : > { %142 = sbr.rel (%p139_p2) target bundleno = 249 (0xf9), region = 32  ;;  %p164_p3 = scmp.lt.s32.totalorder (!%p139_p2), %s528_s7, 3 }
   0xb   : > { %v607_v0 = vld [vmem:[%s769_s1 + $0xac] ss:$12 sps:$4 sm:$0xff]   ;;  %v647_v1 = vmov 0.0   ;;  %v609_v2 = vld [vmem:[%s769_s1 + $0xb0] ss:$12 sps:$4 sm:$0xff]   ;;  %vm648_vm0 = vmmov 0   ;;  %v214_v29 = vlaneseq }
   0xc   : > { %575 = vmatprep.subr.bf16.mxu1 %v647_v1  ;;  %591 = vmatprep.mubr.msk.bf16.mxu1 %vm648_vm0, %v647_v1  ;;  %v610_v3 = vld [vmem:[%s769_s1 + $0xa8] ss:$12 sps:$4 sm:$0xff]   ;;  %v649_v5 = vmov 0   ;;  %v613_v6 = vld [vmem:[%s769_s1 + $0x98] ss:$12 sps:$4 sm:$0xff]   ;;  %s773_s7 = smov (!%p164_p3, %s528_s7), 3 }
   0xd   : > { %357 = vmatprep.subr.bf16.mxu0 %v607_v0  ;;  %576 = vmatpush3.bf16.msra.mxu1 %v609_v2  ;;  %v611_v4 = vld [vmem:[%s769_s1 + $0x94] ss:$12 sps:$4 sm:$0xff]   ;;  %v614_v7 = vld [vmem:[%s769_s1 + $0x90] ss:$12 sps:$4 sm:$0xff]   ;;  %v618_v10 = vld [vmem:[%s769_s1 + $0x78] ss:$12 sps:$4 sm:$0xff]  }
   0xe   : > { %389 = vmatprep.mubr.bf16.mxu0 %v649_v5  ;;  %358 = vmatpush1.bf16.msra.mxu0 %v610_v3  ;;  %v615_v8 = vld [vmem:[%s769_s1 + $0x7c] ss:$12 sps:$4 sm:$0xff]   ;;  %v617_v9 = vld [vmem:[%s769_s1 + $0x80] ss:$12 sps:$4 sm:$0xff]   ;;  %v619_v11 = vld [vmem:[%s769_s1 + $0x64] ss:$12 sps:$4 sm:$0xff]  }
   0xf   : > { %577 = vmatprep.subr.bf16.mxu1 %v647_v1  ;;  %359 = vmatprep.subr.bf16.mxu0 %v611_v4  ;;  %v621_v12 = vld [vmem:[%s769_s1 + $0x68] ss:$12 sps:$4 sm:$0xff]   ;;  %v622_v13 = vld [vmem:[%s769_s1 + $0x60] ss:$12 sps:$4 sm:$0xff]   ;;  %v625_v15 = vld [vmem:[%s769_s1 + $0x50] ss:$12 sps:$4 sm:$0xff]  }
  0x10   : > { %v623_v14 = vld [vmem:[%s769_s1 + $0x4c] ss:$12 sps:$4 sm:$0xff]   ;;  %v626_v16 = vld [vmem:[%s769_s1 + $0x48] ss:$12 sps:$4 sm:$0xff]   ;;  %v630_v19 = vld [vmem:[%s769_s1 + $0x30] ss:$12 sps:$4 sm:$0xff]  }
  0x11   : > { %578 = vmatpush3.bf16.msra.mxu1 %v613_v6  ;;  %v627_v17 = vld [vmem:[%s769_s1 + $0x34] ss:$12 sps:$4 sm:$0xff]   ;;  %v629_v18 = vld [vmem:[%s769_s1 + $0x38] ss:$12 sps:$4 sm:$0xff]   ;;  %v631_v20 = vld [vmem:[%s769_s1 + $0x1c] ss:$12 sps:$4 sm:$0xff]  }
  0x12   : > { %360 = vmatpush1.bf16.msra.mxu0 %v614_v7  ;;  %579 = vmatprep.subr.bf16.mxu1 %v647_v1  ;;  %s529_s27 = sshll.u32 %s773_s7, 3  ;;  %v633_v21 = vld [vmem:[%s769_s1 + $0x20] ss:$12 sps:$4 sm:$0xff]   ;;  %v634_v22 = vld [vmem:[%s769_s1 + $0x18] ss:$12 sps:$4 sm:$0xff]   ;;  %v215_v30 = vshrl.u32 %v214_v29, 7 }
  0x13   : > { %361 = vmatprep.subr.bf16.mxu0 %v615_v8  ;;  %s167_s8 = scalar_lea.vmem %s768_s0, %s529_s27  ;;  %v635_v23 = vld [vmem:[%s769_s1 + $0x4] ss:$12 sps:$4 sm:$0xff]   ;;  %v637_v24 = vld [vmem:[%s769_s1 + $0x8] ss:$12 sps:$4 sm:$0xff]   ;;  %v638_v27 = vld [vmem:[%s769_s1] ss:$12 sps:$4 sm:$0xff]  }
  0x14   : > { %v177_v25 = vld [vmem:[%s167_s8] sm:$0xff]  ;;  %v178_v26 = vld [vmem:[%s167_s8 + $0x8] sm:$0xff]  ;;  %v224_v31 = vsub.s32 2, %v215_v30  ;;  %v216_v33 = vsub.s32 0, %v215_v30  ;;  %v220_v34 = vsub.s32 1, %v215_v30  ;;  %s595_s18 = smul.u32 12, %s773_s7 }
  0x15   : > { %580 = vmatpush3.bf16.msra.mxu1 %v617_v9  ;;  %v179_v28 = vpack.c.bf16 %v178_v26, %v177_v25  ;;  %v212_v32 = vld [vmem:[%s770_s2] sm:$0x7] }
  0x16   : > { %362 = vmatpush1.bf16.msra.mxu0 %v618_v10  ;;  %581 = vmatprep.subr.bf16.mxu1 %v647_v1  ;;  %v225_v35 = vrot.slane %v212_v32, %v224_v31  ;;  %v217_v37 = vrot.slane %v212_v32, %v216_v33  ;;  %v221_v38 = vrot.slane %v212_v32, %v220_v34  ;;  %s174_s21 = scalar_lea.vmem %s771_s3, %s595_s18 }
  0x17   : > { %363 = vmatprep.subr.bf16.mxu0 %v619_v11 }
  0x19   : > { %582 = vmatpush3.bf16.msra.mxu1 %v621_v12 }
  0x1a   : > { %364 = vmatpush1.bf16.msra.mxu0 %v622_v13  ;;  %583 = vmatprep.subr.bf16.mxu1 %v647_v1 }
  0x1b   : > { %365 = vmatprep.subr.bf16.mxu0 %v623_v14 }
  0x1d   : > { %584 = vmatpush3.bf16.msra.mxu1 %v625_v15 }
  0x1e   : > { %366 = vmatpush1.bf16.msra.mxu0 %v626_v16  ;;  %585 = vmatprep.subr.bf16.mxu1 %v647_v1 }
  0x1f   : > { %367 = vmatprep.subr.bf16.mxu0 %v627_v17 }
  0x21   : > { %586 = vmatpush3.bf16.msra.mxu1 %v629_v18 }
  0x22   : > { %368 = vmatpush1.bf16.msra.mxu0 %v630_v19  ;;  %587 = vmatprep.subr.bf16.mxu1 %v647_v1 }
  0x23   : > { %369 = vmatprep.subr.bf16.mxu0 %v631_v20 }
  0x25   : > { %588 = vmatpush3.bf16.msra.mxu1 %v633_v21 }
  0x26   : > { %370 = vmatpush1.bf16.msra.mxu0 %v634_v22  ;;  %589 = vmatprep.subr.bf16.mxu1 %v647_v1 }
  0x27   : > { %371 = vmatprep.subr.bf16.mxu0 %v635_v23 }
  0x29   : > { %590 = vmatpush3.bf16.msra.mxu1 %v637_v24 }
  0x2a   : > { %372 = vmatpush1.bf16.msra.mxu0 %v638_v27 }
  0x2c   : > { %592 = vmatmul.mubr.bf16.vlgmr.msra.gmra.mxu1 %v179_v28 }
  0x2d   : > { %390 = vmatmul.mubr.bf16.vlgmr.msra.gmra.mxu0 %v179_v28 }
  0xec   : > { %v434_v36 = vpop.f32.mrf.mxu1 }
  0xed   : > { %v435_v39 = vadd.f32 %v434_v36, %v225_v35  ;;  %v391_v40 = vpop.f32.mrf.mxu0 }
  0xee   : > { %v593_v41 = vpop.f32.mrf.mxu1  ;;  %v392_v44 = vadd.f32 %v391_v40, %v217_v37 }
  0xef   : > { %v563_v42 = vpack.c.bf16 %v435_v39, %v435_v39  ;;  %v393_v43 = vpop.f32.mrf.mxu0 }
  0xf0   : > { %v394_v45 = vadd.f32 %v393_v43, %v221_v38  ;;  %v437_v46 = vpop.f32.mrf.mxu1 }
  0xf1   : > { %462 = vst [vmem:[%s174_s21 + $0x8] sm:$0xf] %v563_v42  ;;  %v438_v47 = vadd.f32 %v437_v46, %v225_v35  ;;  %v395_v48 = vpop.f32.mrf.mxu0 }
  0xf2   : > { %v562_v49 = vpack.c.bf16 %v394_v45, %v392_v44  ;;  %v594_v50 = vpop.f32.mrf.mxu1  ;;  %v396_v53 = vadd.f32 %v395_v48, %v217_v37 }
  0xf3   : > { %v565_v51 = vpack.c.bf16 %v438_v47, %v438_v47  ;;  %v397_v52 = vpop.f32.mrf.mxu0 }
  0xf4   : > { %461 = vst [vmem:[%s174_s21] sm:$0xff] %v562_v49  ;;  %v398_v54 = vadd.f32 %v397_v52, %v221_v38 }
  0xf5   : > { %464 = vst [vmem:[%s174_s21 + $0x14] sm:$0xf] %v565_v51 }
  0xf6   : > { %v564_v55 = vpack.c.bf16 %v398_v54, %v396_v53 }
  0xf8   : > { %463 = vst [vmem:[%s174_s21 + $0xc] sm:$0xff] %v564_v55 }
  0xf9 PF: > { %s13_s12 = sadd.s32 1, %s645_s12  }
  0xfa   : > { %p10_p4 = scmp.ge.s32.totalorder %s13_s12, 4  }
  0xfc   :  { %12 = sbr.rel (!%p10_p4) target bundleno = 1 (0x1), region = 62 }

// kernel: boring_gpt_block.4
= control target key start
LH: loop header
LB: loop body
LE: loop exit
PB: predicated region body
PF: predicated region fallthrough
CT: control target
= control target key end

     0   :  { %s1382_s12 = smov 0   ;;  %s1384_s13 = smov 0   ;;  %s1560_s0 = inlined_call_operand.vmem [shape: bf16[2,16,384], index: 0, kind: input, shape index: {}, may-alias: {0,1,2}]   ;;  %s1561_s1 = inlined_call_operand.vmem [shape: bf16[2,16,384], index: 1, kind: input, shape index: {}, may-alias: {0,1,2}]   ;;  %s1562_s2 = inlined_call_operand.vmem [shape: bf16[2,16,384], index: 2, kind: input, shape index: {}, may-alias: {0,1,2}]   ;;  %s1563_s3 = inlined_call_operand.vmem [shape: bf16[2,16,128], index: 3, kind: output, shape index: {}]  }
   0x1   :  { %s1386_s14 = smov 0   ;;  %s1388_s15 = smov 0  }
   0x2   :  { %s1390_s16 = smov 0  }
   0x3 LB: > { %s25_s17 = sadd.s32 1, %s1351_s15  ;;  %p41_p1 = scmp.ne.s32.totalorder %s1343_s13, %s1339_s12  ;;  %s1355_s16 = sphi %s1390_s16, %s13_s16   ;;  %s1351_s15 = sphi %s1388_s15, %s1568_s15   ;;  %s1347_s14 = sphi %s1386_s14, %s1567_s14   ;;  %s1343_s13 = sphi %s1384_s13, %s1566_s13   ;;  %s1339_s12 = sphi %s1382_s12, %s1565_s12  }
   0x4   : > { %p27_p0 = scmp.ge.s32.totalorder %s25_s17, 2  ;;  %p42_p2 = scmp.eq.s32.totalorder %s1355_s16, 0 }
   0x5   : > { %s34_s20 = sadd.s32 1, %s1343_s13  ;;  %p1108_p5 = scmp.ge.s32.totalorder %s1355_s16, 2 }
   0x6   : > { %s1570_s17 = smov (%p27_p0, %s25_s17), 0  ;;  %p1413_p3 = por %p42_p2, %p41_p1 }
   0x7   : > { %s29_s19 = ssub.s32 %s1351_s15, %s1570_s17  ;;  %147 = sbr.rel (%p1108_p5) target bundleno = 30 (0x1e), region = 16 }
   0x8   : > { %p32_p4 = scmp.eq.s32.totalorder %s29_s19, 0 }
   0xa   : > { %s1421_s21 = scalar_select %p32_p4, %s1343_s13, %s34_s20  }
   0xc   : > { %150 = sbr.rel (!%p1413_p3) target bundleno = 18 (0x12), region = 20  ;;  %s152_s22 = sand.u32 (%p1413_p3), 1, %s1343_s13  }
   0xd   : > { %s1221_s23 = smul.u32 (%p1413_p3), 24, %s1351_s15  ;;  %s1109_s24 = sshll.u32 (%p1413_p3), %s152_s22, 3 }
   0xe   : > { %s154_s28 = scalar_lea.vmem (%p1413_p3), [#allocation2], %s1109_s24 }
   0xf   : > { %s160_s27 = scalar_lea.vmem (%p1413_p3), %s1560_s0, %s1221_s23 }
  0x10   : > { %v177_v0 = vld [vmem:[%s160_s27] sm:$0xf] (%p1413_p3)  ;;  %v179_v1 = vld [vmem:[%s160_s27 + $0xc] sm:$0xf] (%p1413_p3) }
  0x11   : > { %178 = vst [vmem:[%s154_s28] sm:$0xf] %v177_v0  ;;  %180 = vst [vmem:[%s154_s28 + $0x4] sm:$0xf] %v179_v1 }
  0x12 PF: > { %208 = sbr.rel (!%p1413_p3) target bundleno = 24 (0x18), region = 61  ;;  %s210_s29 = sand.u32 (%p1413_p3), 1, %s1343_s13  }
  0x13   : > { %s1112_s30 = smul.u32 (%p1413_p3), 24, %s1351_s15  ;;  %s1111_s4 = sshll.u32 (%p1413_p3), %s210_s29, 3 }
  0x14   : > { %s212_s8 = scalar_lea.vmem (%p1413_p3), [#allocation3], %s1111_s4 }
  0x15   : > { %s1016_s7 = scalar_lea.vmem (%p1413_p3), %s1561_s1, %s1112_s30 }
  0x16   : > { %v1113_v2 = vld [vmem:[%s1016_s7 + $0x4] sm:$0xf] (%p1413_p3)  ;;  %v1114_v3 = vld [vmem:[%s1016_s7 + $0x10] sm:$0xf] (%p1413_p3) }
  0x17   : > { %234 = vst [vmem:[%s212_s8] sm:$0xf] %v1113_v2  ;;  %236 = vst [vmem:[%s212_s8 + $0x4] sm:$0xf] %v1114_v3 }
  0x18 PF: > { %264 = sbr.rel (!%p1413_p3) target bundleno = 30 (0x1e), region = 102  ;;  %s266_s9 = sand.u32 (%p1413_p3), 1, %s1343_s13  }
  0x19   : > { %s1116_s10 = smul.u32 (%p1413_p3), 24, %s1351_s15  ;;  %s1115_s11 = sshll.u32 (%p1413_p3), %s266_s9, 3 }
  0x1a   : > { %s268_s23 = scalar_lea.vmem (%p1413_p3), [#allocation4], %s1115_s11 }
  0x1b   : > { %s1022_s22 = scalar_lea.vmem (%p1413_p3), %s1562_s2, %s1116_s10 }
  0x1c   : > { %v1117_v4 = vld [vmem:[%s1022_s22 + $0x8] sm:$0xf] (%p1413_p3)  ;;  %v1118_v5 = vld [vmem:[%s1022_s22 + $0x14] sm:$0xf] (%p1413_p3) }
  0x1d   : > { %290 = vst [vmem:[%s268_s23] sm:$0xf] %v1117_v4  ;;  %292 = vst [vmem:[%s268_s23 + $0x4] sm:$0xf] %v1118_v5 }
  0x1e PF: > { %p1119_p6 = scmp.ge.s32.totalorder %s1355_s16, 1  ;;  %p319_p7 = scmp.lt.s32.totalorder %s1355_s16, 3 }
  0x20   : > { %p320_p8 = pnand %p1119_p6, %p319_p7 }
  0x21   : > { %s326_s18 = sand.u32 (!%p320_p8), 1, %s1339_s12   ;;  %s1359_s12 = smov (!%p320_p8), 64  }
  0x22   : > { %323 = sbr.rel (%p320_p8) target bundleno = 857 (0x359), region = 143  ;;  %s1448_s24 = sshll.u32 (!%p320_p8), %s326_s18, 3 }
  0x23   : > { %s335_s25 = scalar_lea.vmem (!%p320_p8), [#allocation3], %s1448_s24  ;;  %s1360_s26 = smov (!%p320_p8), 96  }
  0x24   : > { %s328_s27 = scalar_lea.vmem (!%p320_p8), [#allocation2], %s1448_s24  ;;  %s1361_s28 = smov (!%p320_p8), 32  }
  0x25   : > { %s342_s29 = scalar_lea.vmem (!%p320_p8), [#allocation4], %s1448_s24  ;;  %p377_p9 = scmp.lt.s32.totalorder (!%p320_p8), %s1347_s14, 1 }
  0x27   : > { %v1357_v6 = vmov 0.0   ;;  %vm1358_vm0 = vmmov 0   ;;  %v403_v7 = vld [vmem:[%s335_s25] sm:$0xf]  ;;  %v404_v8 = vld [vmem:[%s335_s25 + $0x4] sm:$0xf] }
  0x28   : > { %1173 = vmatprep.subr.bf16.mxu0 %v1357_v6  ;;  %1175 = vmatprep.mubr.msk.bf16.mxu0 %vm1358_vm0, %v1357_v6  ;;  %vm441_vm1 = vcmask 261120   ;;  %v1126_v9 = vcombine.low %v403_v7, %v404_v8  ;;  %v388_v11 = vld [vmem:[%s328_s27 + $0x4] sm:$0xf]  ;;  %v387_v12 = vld [vmem:[%s328_s27] sm:$0xf]  ;;  %vm648_vm2 = vcmask 130048  }
  0x29   : > { %1179 = vmatprep.subr.bf16.mxu1 %v1357_v6  ;;  %1181 = vmatprep.mubr.msk.bf16.mxu1 %vm1358_vm0, %v1357_v6  ;;  %v1125_v13 = vcombine.low %v387_v12, %v388_v11  ;;  %v1476_v14 = vld [vmem:[%s342_s29] sm:$0xf]  ;;  %v1478_v15 = vld [vmem:[%s342_s29 + $0x4] sm:$0xf]  ;;  %s1572_s14 = smov (!%p377_p9, %s1347_s14), 1  ;;  %vm959_vm3 = vcmask 523264  }
  0x2a   : > { %411 = vrot.lane.b32.xlu1 %v403_v7, %s1359_s12  ;;  %407 = vrot.lane.b32.xlu0 %v403_v7, %s1360_s26  ;;  %v446_v10 = vsel %vm441_vm1, %v1126_v9, 0  ;;  %v1137_v46 = vcombine.low %v1476_v14, %v1478_v15  ;;  %s1149_s30 = sshll.u32 %s1572_s14, 3  ;;  %vm962_vm4 = vcmask 785408  }
  0x2b   : > { %1174 = vmatpush3.bf16.xpose.msra.mxu0 %v446_v10  ;;  %s384_s6 = scalar_lea.vmem %s1563_s3, %s1149_s30 }
  0x2c   : > { %1185 = vmatprep.subr.bf16.mxu0 %v1357_v6 }
  0x2e   : > { %413 = vrot.lane.b32.xlu1 %v404_v8, %s1359_s12  ;;  %409 = vrot.lane.b32.xlu0 %v404_v8, %s1360_s26 }
  0x32   : > { %393 = vrot.lane.b32.xlu1 %v388_v11, %s1360_s26  ;;  %391 = vrot.lane.b32.xlu0 %v387_v12, %s1360_s26 }
  0x33   : > { %1176 = vmatmul.mubr.msk.bf16.vlgmr.msra.gmra.mxu0 %vm441_vm1, %v1125_v13 }
  0x34   : > { %1187 = vmatprep.mubr.msk.bf16.mxu0 %vm1358_vm0, %v1357_v6 }
  0x36   : > { %417 = vrot.lane.b32.xlu1 %v404_v8, %s1361_s28  ;;  %415 = vrot.lane.b32.xlu0 %v403_v7, %s1361_s28 }
  0x3a   : > { %397 = vrot.lane.b32.xlu1 %v388_v11, %s1359_s12  ;;  %395 = vrot.lane.b32.xlu0 %v387_v12, %s1359_s12 }
  0x3e   : > { %401 = vrot.lane.b32.xlu1 %v388_v11, %s1361_s28  ;;  %399 = vrot.lane.b32.xlu0 %v387_v12, %s1361_s28 }
  0x42   : > { %423 = vrot.lane.b32.xlu1 %v1476_v14, %s1360_s26  ;;  %425 = vrot.lane.b32.xlu0 %v1478_v15, %s1360_s26 }
  0x46   : > { %427 = vrot.lane.b32.xlu1 %v1476_v14, %s1359_s12 }
  0x4a   : > { %429 = vrot.lane.b32.xlu1 %v1478_v15, %s1359_s12 }
  0x9c   : > { %v412_v16 = vpop.permute.xlu1 %411  ;;  %v408_v17 = vpop.permute.xlu0 %407 }
  0xa0   : > { %v414_v18 = vpop.permute.xlu1 %413  ;;  %v410_v19 = vpop.permute.xlu0 %409 }
  0xa1   : > { %v1132_v20 = vcombine.low %v412_v16, %v414_v18  ;;  %v1129_v21 = vcombine.low %v408_v17, %v410_v19 }
  0xa3   : > { %v552_v22 = vsel %vm441_vm1, %v1132_v20, 0  ;;  %v499_v23 = vsel %vm441_vm1, %v1129_v21, 0 }
  0xa4   : > { %1180 = vmatpush3.bf16.xpose.msra.mxu1 %v499_v23  ;;  %v394_v24 = vpop.permute.xlu1 %393  ;;  %v392_v25 = vpop.permute.xlu0 %391  ;;  %1186 = vmatpush3.bf16.xpose.msra.mxu0 %v552_v22 }
  0xa5   : > { %1191 = vmatprep.subr.bf16.mxu1 %v1357_v6  ;;  %1197 = vmatprep.subr.bf16.mxu0 %v1357_v6  ;;  %v1128_v28 = vcombine.low %v392_v25, %v394_v24 }
  0xa8   : > { %v418_v26 = vpop.permute.xlu1 %417  ;;  %v416_v27 = vpop.permute.xlu0 %415 }
  0xa9   : > { %v1135_v29 = vcombine.low %v416_v27, %v418_v26 }
  0xab   : > { %v605_v30 = vsel %vm441_vm1, %v1135_v29, 0  ;;  %1182 = vmatmul.mubr.msk.bf16.vlgmr.msra.gmra.mxu1 %vm441_vm1, %v1128_v28 }
  0xac   : > { %v398_v31 = vpop.permute.xlu1 %397  ;;  %1192 = vmatpush3.bf16.xpose.msra.mxu1 %v605_v30  ;;  %v396_v32 = vpop.permute.xlu0 %395  ;;  %1193 = vmatprep.mubr.msk.bf16.mxu1 %vm1358_vm0, %v1357_v6 }
  0xad   : > { %v1131_v33 = vcombine.low %v396_v32, %v398_v31  ;;  %1203 = vmatprep.subr.bf16.mxu1 %v1357_v6 }
  0xaf   : > { %1188 = vmatmul.mubr.msk.bf16.vlgmr.msra.gmra.mxu0 %vm441_vm1, %v1131_v33 }
  0xb0   : > { %v402_v34 = vpop.permute.xlu1 %401  ;;  %v400_v35 = vpop.permute.xlu0 %399  ;;  %1199 = vmatprep.mubr.msk.bf16.mxu0 %vm1358_vm0, %v1357_v6  ;;  %1198 = vmatpush3.bf16.msra.mxu0 %v1137_v46 }
  0xb1   : > { %v1134_v36 = vcombine.low %v400_v35, %v402_v34  ;;  %1209 = vmatprep.subr.bf16.mxu0 %v1357_v6 }
  0xb3   : > { %1194 = vmatmul.mubr.msk.bf16.vlgmr.msra.gmra.mxu1 %vm441_vm1, %v1134_v36 }
  0xb4   : > { %1205 = vmatprep.mubr.msk.bf16.mxu1 %vm1358_vm0, %v1357_v6  ;;  %v424_v42 = vpop.permute.xlu1 %423  ;;  %v426_v43 = vpop.permute.xlu0 %425 }
  0xb5   : > { %v1139_v45 = vcombine.low %v424_v42, %v426_v43 }
  0xb7   : > { %1204 = vmatpush3.bf16.msra.mxu1 %v1139_v45 }
  0xb8   : > { %1215 = vmatprep.subr.bf16.mxu1 %v1357_v6  ;;  %v428_v63 = vpop.permute.xlu1 %427 }
  0xbc   : > { %v430_v2 = vpop.permute.xlu1 %429 }
  0xbd   : > { %v1141_v12 = vcombine.low %v428_v63, %v430_v2 }
  0xf3   : > { %v482_v37 = vpop.f32.mrf.mxu0 }
  0xf4   : > { %v649_v38 = vsel %vm648_vm2, %v482_v37, -inf }
  0xf5   : > { %650 = vmax.xlane.f32.xlu0 %v649_v38  ;;  %v1177_v39 = vpop.f32.mrf.mxu0 }
  0xf7   : > { %v485_v40 = vpop.f32.mrf.mxu0 }
  0xf8   : > { %v652_v41 = vsel %vm648_vm2, %v485_v40, -inf }
  0xf9   : > { %653 = vmax.xlane.f32.xlu1 %v652_v41  ;;  %v1178_v44 = vpop.f32.mrf.mxu0 }
 0x16b   : > { %v535_v47 = vpop.f32.mrf.mxu1 }
 0x16c   : > { %v655_v48 = vsel %vm648_vm2, %v535_v47, -inf }
 0x16d   : > { %v1183_v49 = vpop.f32.mrf.mxu1  ;;  %656 = vmax.xlane.f32.xlu0 %v655_v48 }
 0x16f   : > { %v538_v50 = vpop.f32.mrf.mxu1  ;;  %v588_v51 = vpop.f32.mrf.mxu0 }
 0x170   : > { %v658_v52 = vsel %vm648_vm2, %v538_v50, -inf  ;;  %v661_v53 = vsel %vm648_vm2, %v588_v51, -inf }
 0x171   : > { %v1184_v54 = vpop.f32.mrf.mxu1  ;;  %659 = vmax.xlane.f32.xlu0 %v658_v52  ;;  %662 = vmax.xlane.f32.xlu1 %v661_v53  ;;  %v1189_v55 = vpop.f32.mrf.mxu0 }
 0x173   : > { %v591_v56 = vpop.f32.mrf.mxu0  ;;  %v641_v57 = vpop.f32.mrf.mxu1 }
 0x174   : > { %v667_v58 = vsel %vm648_vm2, %v641_v57, -inf  ;;  %v664_v59 = vsel %vm648_vm2, %v591_v56, -inf }
 0x175   : > { %v1195_v60 = vpop.f32.mrf.mxu1  ;;  %668 = vmax.xlane.f32.xlu1 %v667_v58  ;;  %665 = vmax.xlane.f32.xlu0 %v664_v59  ;;  %v1190_v61 = vpop.f32.mrf.mxu0 }
 0x177   : > { %v644_v62 = vpop.f32.mrf.mxu1 }
 0x178   : > { %v670_v0 = vsel %vm648_vm2, %v644_v62, -inf }
 0x179   : > { %v1196_v1 = vpop.f32.mrf.mxu1  ;;  %671 = vmax.xlane.f32.xlu0 %v670_v0 }
 0x17e   : > { %v651_v3 = vpop.xlane.xlu0 %650 }
 0x17f   : > { %v673_v4 = vsub.f32 %v482_v37, %v651_v3 }
 0x181   : > { %v681_v5 = vmul.f32 1.442695, %v673_v4 }
 0x182   : > { %v654_v7 = vpop.xlane.xlu1 %653 }
 0x183   : > { %v674_v8 = vsub.f32 %v485_v40, %v654_v7  ;;  %1285 = vpow2.f32 %v681_v5 }
 0x185   : > { %v683_v9 = vmul.f32 1.442695, %v674_v8 }
 0x186   : > { %433 = vrot.lane.b32.xlu1 %v1478_v15, %s1361_s28 }
 0x187   : > { %1287 = vpow2.f32 %v683_v9 }
 0x18f   : > { %431 = vrot.lane.b32.xlu0 %v1476_v14, %s1361_s28 }
 0x190   : > { %v1286_v10 = vpop.eup %1285 }
 0x191   : > { %v697_v48 = vsel %vm648_vm2, %v1286_v10, 0.0 }
 0x194   : > { %v1288_v11 = vpop.eup %1287 }
 0x195   : > { %v721_v13 = vpack.c.bf16 %v1288_v11, %v1286_v10 }
 0x197   : > { %1200 = vmatmul.mubr.msk.bf16.vlgmr.msra.gmra.mxu0 %vm648_vm2, %v721_v13 }
 0x198   : > { %1210 = vmatpush3.bf16.msra.mxu0 %v1141_v12  ;;  %1211 = vmatprep.mubr.msk.bf16.mxu0 %vm1358_vm0, %v1357_v6 }
 0x1f6   : > { %v657_v16 = vpop.xlane.xlu0 %656 }
 0x1f7   : > { %v675_v17 = vsub.f32 %v535_v47, %v657_v16 }
 0x1f9   : > { %v685_v18 = vmul.f32 1.442695, %v675_v17 }
 0x1fa   : > { %v660_v19 = vpop.xlane.xlu0 %659  ;;  %v663_v15 = vpop.xlane.xlu1 %662 }
 0x1fb   : > { %1289 = vpow2.f32 %v685_v18  ;;  %v676_v20 = vsub.f32 %v538_v50, %v660_v19  ;;  %v677_v21 = vsub.f32 %v588_v51, %v663_v15 }
 0x1fd   : > { %v687_v22 = vmul.f32 1.442695, %v676_v20  ;;  %v689_v14 = vmul.f32 1.442695, %v677_v21 }
 0x1fe   : > { %v669_v23 = vpop.xlane.xlu1 %668  ;;  %v666_v24 = vpop.xlane.xlu0 %665 }
 0x1ff   : > { %1291 = vpow2.f32 %v687_v22  ;;  %v679_v25 = vsub.f32 %v641_v57, %v669_v23  ;;  %v678_v26 = vsub.f32 %v591_v56, %v666_v24 }
 0x200   : > { %1293 = vpow2.f32 %v689_v14 }
 0x201   : > { %v693_v27 = vmul.f32 1.442695, %v679_v25  ;;  %v691_v28 = vmul.f32 1.442695, %v678_v26 }
 0x202   : > { %v672_v29 = vpop.xlane.xlu0 %671  ;;  %v434_v34 = vpop.permute.xlu1 %433 }
 0x203   : > { %1295 = vpow2.f32 %v693_v27  ;;  %v680_v30 = vsub.f32 %v644_v62, %v672_v29 }
 0x204   : > { %1297 = vpow2.f32 %v691_v28 }
 0x205   : > { %v695_v31 = vmul.f32 1.442695, %v680_v30 }
 0x206   : > { %v432_v35 = vpop.permute.xlu0 %431 }
 0x207   : > { %1299 = vpow2.f32 %v695_v31  ;;  %v1143_v37 = vcombine.low %v432_v35, %v434_v34 }
 0x208   : > { %v1290_v32 = vpop.eup %1289 }
 0x209   : > { %v703_v33 = vsel %vm648_vm2, %v1290_v32, 0.0 }
 0x20a   : > { %704 = vadd.xlane.f32.xlu0 %v703_v33 }
 0x20c   : > { %v1292_v36 = vpop.eup %1291 }
 0x20d   : > { %v1294_v38 = vpop.eup %1293  ;;  %v706_v39 = vsel %vm648_vm2, %v1292_v36, 0.0  ;;  %v722_v40 = vpack.c.bf16 %v1292_v36, %v1290_v32 }
 0x20e   : > { %707 = vadd.xlane.f32.xlu1 %v706_v39  ;;  %v709_v41 = vsel %vm648_vm2, %v1294_v38, 0.0 }
 0x20f   : > { %710 = vadd.xlane.f32.xlu0 %v709_v41  ;;  %1206 = vmatmul.mubr.msk.bf16.vlgmr.msra.gmra.mxu1 %vm648_vm2, %v722_v40 }
 0x210   : > { %v1296_v42 = vpop.eup %1295  ;;  %1216 = vmatpush3.bf16.msra.mxu1 %v1143_v37  ;;  %1217 = vmatprep.mubr.msk.bf16.mxu1 %vm1358_vm0, %v1357_v6  ;;  %v700_v6 = vsel %vm648_vm2, %v1288_v11, 0.0 }
 0x211   : > { %v1298_v43 = vpop.eup %1297  ;;  %v715_v44 = vsel %vm648_vm2, %v1296_v42, 0.0 }
 0x212   : > { %716 = vadd.xlane.f32.xlu1 %v715_v44  ;;  %v712_v45 = vsel %vm648_vm2, %v1298_v43, 0.0  ;;  %v723_v46 = vpack.c.bf16 %v1298_v43, %v1294_v38 }
 0x213   : > { %713 = vadd.xlane.f32.xlu0 %v712_v45 }
 0x214   : > { %v1300_v47 = vpop.eup %1299  ;;  %1212 = vmatmul.mubr.msk.bf16.vlgmr.msra.gmra.mxu0 %vm648_vm2, %v723_v46 }
 0x215   : > { %v718_v49 = vsel %vm648_vm2, %v1300_v47, 0.0  ;;  %v724_v50 = vpack.c.bf16 %v1300_v47, %v1296_v42 }
 0x216   : > { %698 = vadd.xlane.f32.xlu1 %v697_v48 }
 0x217   : > { %719 = vadd.xlane.f32.xlu0 %v718_v49  ;;  %1218 = vmatmul.mubr.msk.bf16.vlgmr.msra.gmra.mxu1 %vm648_vm2, %v724_v50 }
 0x21b   : > { %701 = vadd.xlane.f32.xlu0 %v700_v6 }
 0x257   : > { %v766_v51 = vpop.f32.mrf.mxu0 }
 0x259   : > { %v1201_v52 = vpop.f32.mrf.mxu0 }
 0x25b   : > { %v769_v53 = vpop.f32.mrf.mxu0 }
 0x25d   : > { %v1202_v54 = vpop.f32.mrf.mxu0 }
 0x293   : > { %v705_v55 = vpop.xlane.xlu0 %704 }
 0x294   : > { %1301 = vrcp.f32 %v705_v55 }
 0x297   : > { %v708_v57 = vpop.xlane.xlu1 %707 }
 0x298   : > { %v711_v56 = vpop.xlane.xlu0 %710  ;;  %1303 = vrcp.f32 %v708_v57 }
 0x299   : > { %1305 = vrcp.f32 %v711_v56 }
 0x29b   : > { %v717_v59 = vpop.xlane.xlu1 %716 }
 0x29c   : > { %v714_v58 = vpop.xlane.xlu0 %713 }
 0x29d   : > { %1307 = vrcp.f32 %v714_v58 }
 0x29e   : > { %1309 = vrcp.f32 %v717_v59 }
 0x29f   : > { %v699_v25 = vpop.xlane.xlu1 %698 }
 0x2a0   : > { %v720_v60 = vpop.xlane.xlu0 %719 }
 0x2a1   : > { %1311 = vrcp.f32 %v720_v60  ;;  %v1302_v63 = vpop.eup %1301 }
 0x2a2   : > { %1313 = vrcp.f32 %v699_v25 }
 0x2a4   : > { %v702_v26 = vpop.xlane.xlu0 %701 }
 0x2a5   : > { %v1304_v0 = vpop.eup %1303  ;;  %1315 = vrcp.f32 %v702_v26 }
 0x2a6   : > { %v1306_v9 = vpop.eup %1305 }
 0x2aa   : > { %v1308_v11 = vpop.eup %1307 }
 0x2ab   : > { %v1310_v18 = vpop.eup %1309 }
 0x2ae   : > { %v1312_v15 = vpop.eup %1311 }
 0x2af   : > { %v1314_v28 = vpop.eup %1313 }
 0x2b0   : > { %v925_v35 = vmul.f32 %v1314_v28, %v766_v51 }
 0x2b2   : > { %v1316_v29 = vpop.eup %1315 }
 0x2b3   : > { %v926_v36 = vmul.f32 %v1316_v29, %v769_v53 }
 0x2cf   : > { %v814_v61 = vpop.f32.mrf.mxu1 }
 0x2d0   : > { %v927_v2 = vmul.f32 %v1302_v63, %v814_v61 }
 0x2d1   : > { %v1207_v62 = vpop.f32.mrf.mxu1 }
 0x2d3   : > { %v817_v1 = vpop.f32.mrf.mxu1 }
 0x2d4   : > { %v928_v3 = vmul.f32 %v1304_v0, %v817_v1  ;;  %v862_v4 = vpop.f32.mrf.mxu0 }
 0x2d5   : > { %v1208_v5 = vpop.f32.mrf.mxu1  ;;  %v929_v13 = vmul.f32 %v1306_v9, %v862_v4 }
 0x2d6   : > { %v1267_v7 = vpack.i.bf16 %v928_v3, %v927_v2  ;;  %v1213_v8 = vpop.f32.mrf.mxu0 }
 0x2d7   : > { %v910_v10 = vpop.f32.mrf.mxu1 }
 0x2d8   : > { %v865_v12 = vpop.f32.mrf.mxu0  ;;  %1268 = vrot.lane.b32.xlu1 %v1267_v7, %s1361_s28  ;;  %v931_v22 = vmul.f32 %v1310_v18, %v910_v10 }
 0x2d9   : > { %v930_v16 = vmul.f32 %v1308_v11, %v865_v12  ;;  %v1219_v17 = vpop.f32.mrf.mxu1 }
 0x2da   : > { %v1214_v19 = vpop.f32.mrf.mxu0 }
 0x2db   : > { %v1272_v20 = vpack.i.bf16 %v930_v16, %v929_v13  ;;  %v913_v21 = vpop.f32.mrf.mxu1 }
 0x2dc   : > { %v932_v14 = vmul.f32 %v1312_v15, %v913_v21 }
 0x2dd   : > { %1273 = vrot.lane.b32.xlu0 %v1272_v20, %s1359_s12  ;;  %v1220_v23 = vpop.f32.mrf.mxu1 }
 0x2de   : > { %v1277_v24 = vpack.i.bf16 %v932_v14, %v931_v22 }
 0x2e0   : > { %1278 = vrot.lane.b32.xlu1 %v1277_v24, %s1360_s26 }
 0x34a   : > { %v1269_v27 = vpop.permute.xlu1 %1268 }
 0x34b   : > { %v1271_v30 = vunpack.i.h.bf16 %v1269_v27  ;;  %v1270_v31 = vunpack.i.l.bf16 %v1269_v27 }
 0x34d   : > { %v957_v38 = vsel %vm441_vm1, %v925_v35, %v1270_v31  ;;  %v958_v39 = vsel %vm441_vm1, %v926_v36, %v1271_v30 }
 0x34f   : > { %v1274_v32 = vpop.permute.xlu0 %1273 }
 0x350   : > { %v1276_v33 = vunpack.i.h.bf16 %v1274_v32  ;;  %v1275_v34 = vunpack.i.l.bf16 %v1274_v32 }
 0x352   : > { %v1279_v37 = vpop.permute.xlu1 %1278  ;;  %v961_v42 = vsel %vm959_vm3, %v958_v39, %v1276_v33  ;;  %v960_v43 = vsel %vm959_vm3, %v957_v38, %v1275_v34 }
 0x353   : > { %v1281_v40 = vunpack.i.h.bf16 %v1279_v37  ;;  %v1280_v41 = vunpack.i.l.bf16 %v1279_v37 }
 0x355   : > { %v963_v44 = vsel %vm962_vm4, %v960_v43, %v1280_v41  ;;  %v964_v45 = vsel %vm962_vm4, %v961_v42, %v1281_v40 }
 0x356   : > { %v1155_v46 = vpack.c.bf16 %v964_v45, %v963_v44 }
 0x358   : > { %1156 = vst [vmem:[%s384_s6] sm:$0xff] %v1155_v46  }
 0x359 PF: > { %s13_s16 = sadd.s32 1, %s1355_s16   ;;  %s1565_s12 = smov %s1343_s13 }
 0x35a   : > { %p10_p10 = scmp.ge.s32.totalorder %s13_s16, 4   ;;  %s1566_s13 = smov %s1421_s21 }
 0x35b   : > { %s1567_s14 = smov %s1351_s15  ;;  %s1568_s15 = smov %s1570_s17 }
 0x35c   :  { %12 = sbr.rel (!%p10_p10) target bundleno = 3 (0x3), region = 206 }

// kernel: boring_gpt_block.5
= control target key start
LH: loop header
LB: loop body
LE: loop exit
PB: predicated region body
PF: predicated region fallthrough
CT: control target
= control target key end

     0   :  { %s1671_s0 = inlined_call_operand.vmem [shape: f32[32,128], index: 0, kind: input, shape index: {}]   ;;  %s1672_s1 = inlined_call_operand.vmem [shape: bf16[32,128], index: 1, kind: input, shape index: {}]   ;;  %s1673_s2 = inlined_call_operand.vmem [shape: bf16[128,128], index: 2, kind: input, shape index: {}]   ;;  %s1674_s3 = inlined_call_operand.vmem [shape: f32[1,128], index: 3, kind: input, shape index: {}]   ;;  %s1675_s4 = inlined_call_operand.vmem [shape: f32[1,128], index: 4, kind: input, shape index: {}]   ;;  %s1676_s5 = inlined_call_operand.vmem [shape: f32[1,128], index: 5, kind: input, shape index: {}]   ;;  %s1677_s6 = inlined_call_operand.vmem [shape: bf16[128,256], index: 6, kind: input, shape index: {}]   ;;  %s1678_s7 = inlined_call_operand.vmem [shape: f32[1,256], index: 7, kind: input, shape index: {}]   ;;  %s1679_s8 = inlined_call_operand.vmem [shape: bf16[256,128], index: 8, kind: input, shape index: {}]   ;;  %s1680_s9 = inlined_call_operand.vmem [shape: f32[1,128], index: 9, kind: input, shape index: {}]   ;;  %s1681_s10 = inlined_call_operand.vmem [shape: f32[1,128], index: 10, kind: input, shape index: {}]   ;;  %s1682_s11 = inlined_call_operand.vmem [shape: f32[1,128], index: 11, kind: input, shape index: {}]   ;;  %s1683_s12 = inlined_call_operand.hbm [shape: f32[32,128], index: 12, kind: output, shape index: {}]  }
   0x1   :  { %1685 = sst [smem:[#allocation7_spill]] %s1672_s1 }
   0x2   :  { %17 = vsyncpa [#allocation3], 0 }
   0x3   :  { %19 = vsyncpa [#allocation3 + $0x1], 0  ;;  %s1416_s21 = smov 0   ;;  %s1418_s22 = smov 0  }
   0x4   :  { %s1420_s23 = smov 0   ;;  %s1422_s24 = smov 0  }
   0x5 LB: > { %1686 = sst [smem:[#allocation5_spill]] %s1339_s23  ;;  %s1437_s25 = sadd.s32 4294967295, %s1343_s24   ;;  %s1343_s24 = sphi %s1422_s24, %s1695_s24   ;;  %s1339_s23 = sphi %s1420_s23, %s1692_s23   ;;  %s1335_s22 = sphi %s1418_s22, %s1694_s22   ;;  %s1331_s21 = sphi %s1416_s21, %s1693_s21  }
   0x6   : > { %s1069_s26 = sadd.s32 4294967294, %s1343_s24   ;;  %s1441_s27 = sadd.s32 1, %s1343_s24  }
   0x7   : > { %s294_s28 = sadd.s32 1, %s1339_s23  ;;  %s291_s29 = ssub.s32 %s1343_s24, %s1441_s27 }
   0x8   : > { %p304_p0 = scmp.ne.s32.totalorder %s1339_s23, %s1335_s22  ;;  %p292_p1 = scmp.eq.s32.totalorder %s291_s29, 0 }
   0x9   : > { %p305_p2 = scmp.eq.s32.totalorder %s1437_s25, 1  ;;  %p310_p3 = scmp.ne.s32.totalorder %s1335_s22, %s1331_s21 }
   0xa   : > { %p311_p4 = scmp.eq.s32.totalorder %s1069_s26, 1  ;;  %p1072_p7 = scmp.ge.s32.totalorder %s1343_s24, 1 }
   0xb   : > { %s1452_s30 = scalar_select %p292_p1, %s1339_s23, %s294_s28  }
   0xc   : > { %p1454_p5 = por %p305_p2, %p304_p0  ;;  %p1458_p6 = por %p311_p4, %p310_p3 }
   0xd   : > { %1687 = sst [smem:[#allocation6_spill]] %s1452_s30  ;;  %p377_p8 = scmp.lt.s32.totalorder %s1343_s24, 3 }
   0xf   : > { %p378_p9 = pnand %p1072_p7, %p377_p8 }
  0x10   : > { %s1074_s19 = sshll.u32 (!%p378_p9), %s1437_s25, 1  ;;  %s1690_s1 = sld [smem:[#allocation7_spill]] (!%p378_p9) }
  0x11   : > { %381 = sbr.rel (%p378_p9) target bundleno = 1295 (0x50f), region = 68  ;;  %p425_p10 = scmp.lt.s32.totalorder (!%p378_p9), %s1074_s19, 3 }
  0x12   : > { %s1130_s15 = sshll.u32 (!%p378_p9), %s1437_s25, 8  ;;  %s1348_s25 = smov (!%p378_p9), [#allocation2]  }
  0x13   : > { %s1627_s26 = scalar_lea.hbm (!%p378_p9), %s1683_s12, %s1130_s15 }
  0x16   : > { %v1226_v0 = vld [vmem:[%s1673_s2 + $0x38] sm:$0xff]   ;;  %v1345_v1 = vmov 0.0   ;;  %v1227_v2 = vld [vmem:[%s1673_s2 + $0x30] sm:$0xff]   ;;  %vm1346_vm0 = vmmov 0   ;;  %s1697_s19 = smov (!%p425_p10, %s1074_s19), 3  ;;  %v1228_v3 = vld [vmem:[%s1673_s2 + $0x28] sm:$0xff]  }
  0x17   : > { %1162 = vmatprep.subr.bf16.mxu0 %v1345_v1  ;;  %1178 = vmatprep.mubr.msk.bf16.mxu0 %vm1346_vm0, %v1345_v1  ;;  %s1077_s28 = sshll.u32 %s1697_s19, 2  ;;  %v1229_v4 = vld [vmem:[%s1673_s2 + $0x20] sm:$0xff]   ;;  %v1230_v5 = vld [vmem:[%s1673_s2 + $0x18] sm:$0xff]   ;;  %v1231_v6 = vld [vmem:[%s1673_s2 + $0x10] sm:$0xff]   ;;  %s1075_s23 = sshll.u32 %s1697_s19, 3  ;;  %v1347_v40 = vmov 0  }
  0x18   : > { %1163 = vmatpush3.bf16.msra.mxu0 %v1226_v0  ;;  %s434_s16 = scalar_lea.vmem %s1690_s1, %s1077_s28  ;;  %v1232_v7 = vld [vmem:[%s1673_s2 + $0x8] sm:$0xff]   ;;  %v1233_v8 = vld [vmem:[%s1673_s2] sm:$0xff]   ;;  %s428_s20 = scalar_lea.vmem %s1671_s0, %s1075_s23  ;;  %v1235_v21 = vld [vmem:[%s1677_s6 + $0x74] ss:$8 sps:$4 sm:$0xff]   ;;  %744 = vmatprep.mubr.bf16.mxu1 %v1347_v40 }
  0x19   : > { %1164 = vmatprep.subr.bf16.mxu0 %v1345_v1  ;;  %v1234_v9 = vld [vmem:[%s434_s16] sm:$0xff]   ;;  %v439_v17 = vld [vmem:[%s428_s20 + $0x8] sm:$0xff]  ;;  %v1237_v22 = vld [vmem:[%s1677_s6 + $0x70] ss:$8 sps:$4 sm:$0xff]   ;;  %712 = vmatprep.subr.bf16.mxu1 %v1235_v21  ;;  %s421_s19 = sand.u32 1, %s1335_s22  }
  0x1a   : > { %v1078_v10 = vld [vmem:[%s1674_s3] ss:$0 sm:$0xff]  ;;  %713 = vmatpush1.bf16.msra.mxu1 %v1237_v22  ;;  %v1238_v31 = vld [vmem:[%s1677_s6 + $0x64] ss:$8 sps:$4 sm:$0xff]   ;;  %v1241_v33 = vld [vmem:[%s1677_s6 + $0x54] ss:$8 sps:$4 sm:$0xff]  }
  0x1b   : > { %v438_v12 = vld [vmem:[%s428_s20] sm:$0xff]  ;;  %714 = vmatprep.subr.bf16.mxu1 %v1238_v31  ;;  %v1243_v34 = vld [vmem:[%s1677_s6 + $0x50] ss:$8 sps:$4 sm:$0xff]   ;;  %v1247_v37 = vld [vmem:[%s1677_s6 + $0x34] ss:$8 sps:$4 sm:$0xff]   ;;  %s1073_s28 = sshll.u32 %s421_s19, 4 }
  0x1c   : > { %1165 = vmatpush3.bf16.msra.mxu0 %v1227_v2  ;;  %v1240_v32 = vld [vmem:[%s1677_s6 + $0x60] ss:$8 sps:$4 sm:$0xff]   ;;  %v1244_v35 = vld [vmem:[%s1677_s6 + $0x44] ss:$8 sps:$4 sm:$0xff]   ;;  %v1249_v38 = vld [vmem:[%s1677_s6 + $0x30] ss:$8 sps:$4 sm:$0xff]  }
  0x1d   : > { %1166 = vmatprep.subr.bf16.mxu0 %v1345_v1  ;;  %v1246_v36 = vld [vmem:[%s1677_s6 + $0x40] ss:$8 sps:$4 sm:$0xff]   ;;  %v1250_v39 = vld [vmem:[%s1677_s6 + $0x24] ss:$8 sps:$4 sm:$0xff]   ;;  %v1253_v42 = vld [vmem:[%s1677_s6 + $0x14] ss:$8 sps:$4 sm:$0xff]  }
  0x1e   : > { %715 = vmatpush1.bf16.msra.mxu1 %v1240_v32  ;;  %v1252_v41 = vld [vmem:[%s1677_s6 + $0x20] ss:$8 sps:$4 sm:$0xff]   ;;  %v1255_v43 = vld [vmem:[%s1677_s6 + $0x10] ss:$8 sps:$4 sm:$0xff]   ;;  %v1256_v44 = vld [vmem:[%s1677_s6 + $0x4] ss:$8 sps:$4 sm:$0xff]  }
  0x1f   : > { %716 = vmatprep.subr.bf16.mxu1 %v1241_v33  ;;  %v1258_v45 = vld [vmem:[%s1677_s6] ss:$8 sps:$4 sm:$0xff]   ;;  %v1259_v46 = vld [vmem:[%s1679_s8 + $0x78] sm:$0xff]   ;;  %v1261_v48 = vld [vmem:[%s1679_s8 + $0x70] sm:$0xff]   ;;  %s423_s23 = scalar_lea.vmem [#allocation2], %s1073_s28  ;;  %s1631_s16 = scalar_lea.sflag [#allocation3], %s421_s19 }
  0x20   : > { %1167 = vmatpush3.bf16.msra.mxu0 %v1228_v3  ;;  %v1260_v47 = vld [vmem:[%s1679_s8 + $0x38] sm:$0xff]   ;;  %v1262_v49 = vld [vmem:[%s1679_s8 + $0x30] sm:$0xff]   ;;  %v1263_v50 = vld [vmem:[%s1679_s8 + $0x68] sm:$0xff]   ;;  %s995_s17 = sshll.u32 %s423_s23, 4  ;;  %s1287_s28 = sshll.u32 %s1348_s25, 4  ;;  %s1629_s17 = int_to_ptr.vmem [resolvable:$true] %s995_s17  ;;  %s1288_s28 = int_to_ptr.vmem [resolvable:$false] %s1287_s28 }
  0x21   : > { %1168 = vmatprep.subr.bf16.mxu0 %v1345_v1  ;;  %v1264_v51 = vld [vmem:[%s1679_s8 + $0x28] sm:$0xff]   ;;  %v1265_v52 = vld [vmem:[%s1679_s8 + $0x60] sm:$0xff]   ;;  %v1267_v54 = vld [vmem:[%s1679_s8 + $0x58] sm:$0xff]   ;;  %s1283_s29 = scalar_lea.vmem %s1629_s17, 256  ;;  %s1289_s1 = scalar_lea.vmem %s1288_s28, 512 }
  0x22   : > { %717 = vmatpush1.bf16.msra.mxu1 %v1243_v34  ;;  %v1266_v53 = vld [vmem:[%s1679_s8 + $0x20] sm:$0xff]   ;;  %v1268_v55 = vld [vmem:[%s1679_s8 + $0x18] sm:$0xff]   ;;  %p1284_p11 = scmp.ne.s32.totalorder %s1629_s17, %s1283_s29  ;;  %p1290_p0 = scmp.lt.s32.totalorder %s1629_s17, %s1288_s28 }
  0x23   : > { %718 = vmatprep.subr.bf16.mxu1 %v1244_v35  ;;  %v1088_v0 = vld [vmem:[%s1675_s4] ss:$0 sm:$0xff]  ;;  %p1291_p1 = scmp.lt.s32.totalorder %s1289_s1, %s1283_s29 }
  0x24   : > { %1169 = vmatpush3.bf16.msra.mxu0 %v1229_v4  ;;  %v1089_v4 = vld [vmem:[%s1676_s5] ss:$0 sm:$0xff]  ;;  %p1285_p12 = pnand %p1284_p11, %p1454_p5 }
  0x25   : > { %1170 = vmatprep.subr.bf16.mxu0 %v1345_v1  ;;  %p1292_p2 = por %p1291_p1, %p1290_p0 }
  0x26   : > { %719 = vmatpush1.bf16.msra.mxu1 %v1246_v36  ;;  %p1286_p13 = pneg %p1285_p12 }
  0x27   : > { %720 = vmatprep.subr.bf16.mxu1 %v1247_v37  ;;  %v1106_v37 = vld [vmem:[%s1680_s9] ss:$0 sm:$0xff] }
  0x28   : > { %1171 = vmatpush3.bf16.msra.mxu0 %v1230_v5  ;;  %p1293_p3 = pnand %p1292_p2, %p1286_p13 }
  0x29   : > { %1172 = vmatprep.subr.bf16.mxu0 %v1345_v1 }
  0x2a   : > { %721 = vmatpush1.bf16.msra.mxu1 %v1249_v38 }
  0x2b   : > { %722 = vmatprep.subr.bf16.mxu1 %v1250_v39 }
  0x2c   : > { %1173 = vmatpush3.bf16.msra.mxu0 %v1231_v6 }
  0x2d   : > { %1174 = vmatprep.subr.bf16.mxu0 %v1345_v1 }
  0x2e   : > { %723 = vmatpush1.bf16.msra.mxu1 %v1252_v41 }
  0x2f   : > { %724 = vmatprep.subr.bf16.mxu1 %v1253_v42 }
  0x30   : > { %1175 = vmatpush3.bf16.msra.mxu0 %v1232_v7 }
  0x31   : > { %1176 = vmatprep.subr.bf16.mxu0 %v1345_v1 }
  0x32   : > { %725 = vmatpush1.bf16.msra.mxu1 %v1255_v43 }
  0x33   : > { %726 = vmatprep.subr.bf16.mxu1 %v1256_v44 }
  0x34   : > { %1177 = vmatpush3.bf16.msra.mxu0 %v1233_v8 }
  0x35   : > { %1140 = vmatprep.subr.bf16.mxu0 %v1259_v46 }
  0x36   : > { %727 = vmatpush1.bf16.msra.mxu1 %v1258_v45 }
  0x37   : > { %1179 = vmatmul.mubr.bf16.vlgmr.msra.gmra.mxu0 %v1234_v9  ;;  %v1269_v9 = vld [vmem:[%s1679_s8 + $0x50] sm:$0xff]  }
  0x38   : > { %1141 = vmatpush3.bf16.msra.mxu0 %v1260_v47 }
  0x39   : > { %1142 = vmatprep.subr.bf16.mxu0 %v1261_v48 }
  0x3c   : > { %1143 = vmatpush3.bf16.msra.mxu0 %v1262_v49 }
  0x3d   : > { %1144 = vmatprep.subr.bf16.mxu0 %v1263_v50 }
  0x40   : > { %1145 = vmatpush3.bf16.msra.mxu0 %v1264_v51 }
  0x41   : > { %1146 = vmatprep.subr.bf16.mxu0 %v1265_v52 }
  0x44   : > { %1147 = vmatpush3.bf16.msra.mxu0 %v1266_v53 }
  0x45   : > { %1148 = vmatprep.subr.bf16.mxu0 %v1267_v54 }
  0x48   : > { %1149 = vmatpush3.bf16.msra.mxu0 %v1268_v55 }
  0x49   : > { %1150 = vmatprep.subr.bf16.mxu0 %v1269_v9 }
  0xf7   : > { %v553_v11 = vpop.f32.mrf.mxu0 }
  0xf8   : > { %v554_v13 = vadd.f32 %v1078_v10, %v553_v11  ;;  %v1271_v11 = vld [vmem:[%s1679_s8 + $0x48] sm:$0xff]  }
  0xf9   : > { %v1180_v14 = vpop.f32.mrf.mxu0 }
  0xfa   : > { %v560_v15 = vadd.f32 %v554_v13, %v438_v12  ;;  %v1272_v12 = vld [vmem:[%s1679_s8 + $0x8] sm:$0xff]   ;;  %v1273_v13 = vld [vmem:[%s1679_s8 + $0x40] sm:$0xff]  }
  0xfb   : > { %v556_v16 = vpop.f32.mrf.mxu0  ;;  %v1274_v14 = vld [vmem:[%s1679_s8] sm:$0xff]  }
  0xfc   : > { %v557_v18 = vadd.f32 %v1078_v10, %v556_v16  ;;  %562 = vadd.xlane.f32.xlu0 %v560_v15  ;;  %v1270_v10 = vld [vmem:[%s1679_s8 + $0x10] sm:$0xff]  }
  0xfd   : > { %v1181_v19 = vpop.f32.mrf.mxu0  ;;  %1151 = vmatpush3.bf16.msra.mxu0 %v1270_v10 }
  0xfe   : > { %v561_v20 = vadd.f32 %v557_v18, %v439_v17  ;;  %1152 = vmatprep.subr.bf16.mxu0 %v1271_v11  ;;  %v620_v19 = vld [vmem:[%s1678_s7] sm:$0x3] }
 0x100   : > { %564 = vadd.xlane.f32.xlu0 %v561_v20 }
 0x101   : > { %1153 = vmatpush3.bf16.msra.mxu0 %v1272_v12 }
 0x102   : > { %1154 = vmatprep.subr.bf16.mxu0 %v1273_v13 }
 0x105   : > { %1155 = vmatpush3.bf16.msra.mxu0 %v1274_v14 }
 0x185   : > { %v563_v23 = vpop.xlane.xlu0 %562 }
 0x186   : > { %v567_v24 = vmul.f32 0.0078125, %v563_v23 }
 0x188   : > { %v1504_v25 = vsub.f32 %v560_v15, %v567_v24  ;;  %v622_v15 = vlaneseq }
 0x189   : > { %v565_v26 = vpop.xlane.xlu0 %564 }
 0x18a   : > { %v568_v27 = vmul.f32 0.0078125, %v565_v26  ;;  %v571_v28 = vmul.f32 %v1504_v25, %v1504_v25  ;;  %v623_v16 = vshrl.u32 %v622_v15, 7 }
 0x18c   : > { %v1508_v29 = vsub.f32 %v561_v20, %v568_v27  ;;  %573 = vadd.xlane.f32.xlu1 %v571_v28  ;;  %v628_v17 = vsub.s32 1, %v623_v16  ;;  %v624_v18 = vsub.s32 0, %v623_v16 }
 0x18e   : > { %v572_v30 = vmul.f32 %v1508_v29, %v1508_v29  ;;  %v629_v21 = vrot.slane %v620_v19, %v628_v17  ;;  %v625_v22 = vrot.slane %v620_v19, %v624_v18 }
 0x190   : > { %575 = vadd.xlane.f32.xlu1 %v572_v30 }
 0x215   : > { %v574_v56 = vpop.xlane.xlu1 %573 }
 0x216   : > { %v577_v57 = vmul.f32 0.0078125, %v574_v56 }
 0x218   : > { %v579_v58 = vadd.f32 1e-05, %v577_v57 }
 0x219   : > { %v576_v59 = vpop.xlane.xlu1 %575 }
 0x21a   : > { %1275 = vrsqrt.f32 %v579_v58  ;;  %v578_v60 = vmul.f32 0.0078125, %v576_v59 }
 0x21c   : > { %v580_v61 = vadd.f32 1e-05, %v578_v60 }
 0x21e   : > { %1277 = vrsqrt.f32 %v580_v61 }
 0x227   : > { %v1276_v62 = vpop.eup %1275 }
 0x228   : > { %v583_v63 = vmul.f32 %v1276_v62, %v1504_v25  ;;  %v1123_v62 = vld [vmem:[%s1681_s10] ss:$0 sm:$0xff] }
 0x22a   : > { %v592_v3 = vmul.f32 %v1088_v0, %v583_v63 }
 0x22b   : > { %v1278_v1 = vpop.eup %1277 }
 0x22c   : > { %v584_v2 = vmul.f32 %v1278_v1, %v1508_v29  ;;  %v601_v6 = vadd.f32 %v1089_v4, %v592_v3 }
 0x22e   : > { %v593_v5 = vmul.f32 %v1088_v0, %v584_v2  ;;  %v1124_v0 = vld [vmem:[%s1682_s11] ss:$0 sm:$0xff] }
 0x230   : > { %v602_v7 = vadd.f32 %v1089_v4, %v593_v5 }
 0x232   : > { %v603_v8 = vpack.c.bf16 %v602_v7, %v601_v6 }
 0x234   : > { %745 = vmatmul.mubr.bf16.vlgmr.msra.gmra.mxu1 %v603_v8 }
 0x2f4   : > { %v746_v20 = vpop.f32.mrf.mxu1 }
 0x2f5   : > { %v747_v27 = vadd.f32 %v746_v20, %v625_v22 }
 0x2f6   : > { %v748_v23 = vpop.f32.mrf.mxu1 }
 0x2f7   : > { %v749_v25 = vadd.f32 %v748_v23, %v629_v21  ;;  %v755_v33 = vmax.f32 %v747_v27, 0.0 }
 0x2f8   : > { %v750_v24 = vpop.f32.mrf.mxu1 }
 0x2f9   : > { %v751_v26 = vadd.f32 %v750_v24, %v625_v22  ;;  %v756_v31 = vmax.f32 %v749_v25, 0.0 }
 0x2fa   : > { %v752_v28 = vpop.f32.mrf.mxu1 }
 0x2fb   : > { %v753_v29 = vadd.f32 %v752_v28, %v629_v21  ;;  %v757_v30 = vmax.f32 %v751_v26, 0.0 }
 0x2fd   : > { %v758_v32 = vmax.f32 %v753_v29, 0.0  ;;  %v759_v35 = vpack.c.bf16 %v757_v30, %v755_v33 }
 0x2ff   : > { %v760_v34 = vpack.c.bf16 %v758_v32, %v756_v31 }
 0x301   : > { %928 = vmatprep.mubr.bf16.mxu0 %v760_v34 }
 0x302   : > { %929 = vmatmul.mubr.bf16.vlgmr.msra.gmra.mxu0 %v759_v35 }
 0x3c2   : > { %v1156_v36 = vpop.f32.mrf.mxu0 }
 0x3c4   : > { %v1157_v38 = vpop.f32.mrf.mxu0 }
 0x3c5   : > { %v1158_v39 = vadd.f32 %v1157_v38, %v1156_v36 }
 0x3c6   : > { %v1159_v40 = vpop.f32.mrf.mxu0 }
 0x3c7   : > { %v931_v41 = vadd.f32 %v1158_v39, %v1106_v37 }
 0x3c8   : > { %v1160_v42 = vpop.f32.mrf.mxu0 }
 0x3c9   : > { %v1161_v43 = vadd.f32 %v1160_v42, %v1159_v40  ;;  %v937_v44 = vadd.f32 %v931_v41, %v601_v6 }
 0x3cb   : > { %v934_v45 = vadd.f32 %v1161_v43, %v1106_v37  ;;  %939 = vadd.xlane.f32.xlu0 %v937_v44 }
 0x3cd   : > { %v938_v46 = vadd.f32 %v934_v45, %v602_v7 }
 0x3cf   : > { %941 = vadd.xlane.f32.xlu1 %v938_v46 }
 0x454   : > { %v940_v47 = vpop.xlane.xlu0 %939 }
 0x455   : > { %v943_v48 = vmul.f32 0.0078125, %v940_v47 }
 0x457   : > { %v945_v49 = vsub.f32 %v937_v44, %v943_v48 }
 0x458   : > { %v942_v50 = vpop.xlane.xlu1 %941 }
 0x459   : > { %v944_v51 = vmul.f32 0.0078125, %v942_v50  ;;  %v947_v52 = vmul.f32 %v945_v49, %v945_v49 }
 0x45b   : > { %v946_v53 = vsub.f32 %v938_v46, %v944_v51  ;;  %949 = vadd.xlane.f32.xlu0 %v947_v52 }
 0x45d   : > { %v948_v54 = vmul.f32 %v946_v53, %v946_v53 }
 0x45f   : > { %951 = vadd.xlane.f32.xlu1 %v948_v54 }
 0x4e4   : > { %v950_v55 = vpop.xlane.xlu0 %949 }
 0x4e5   : > { %v953_v56 = vmul.f32 0.0078125, %v950_v55 }
 0x4e7   : > { %v955_v57 = vadd.f32 1e-05, %v953_v56 }
 0x4e8   : > { %v952_v58 = vpop.xlane.xlu1 %951 }
 0x4e9   : > { %1279 = vrsqrt.f32 %v955_v57  ;;  %v954_v59 = vmul.f32 0.0078125, %v952_v58 }
 0x4eb   : > { %v956_v60 = vadd.f32 1e-05, %v954_v59 }
 0x4ed   : > { %1281 = vrsqrt.f32 %v956_v60 }
 0x4f6   : > { %v1280_v61 = vpop.eup %1279 }
 0x4f7   : > { %v959_v63 = vmul.f32 %v1280_v61, %v945_v49 }
 0x4f9   : > { %v968_v1 = vmul.f32 %v1123_v62, %v959_v63 }
 0x4fa   : > { %v1282_v2 = vpop.eup %1281 }
 0x4fb   : > { %v960_v3 = vmul.f32 %v1282_v2, %v946_v53  ;;  %v977_v4 = vadd.f32 %v1124_v0, %v968_v1 }
 0x4fd   : > { %v969_v5 = vmul.f32 %v1123_v62, %v960_v3  ;;  %979 = vst [vmem:[%s423_s23] sm:$0xff] %v977_v4 }
 0x4ff   : > { %v978_v6 = vadd.f32 %v1124_v0, %v969_v5 }
 0x501   : > { %980 = vst [vmem:[%s423_s23 + $0x8] sm:$0xff] %v978_v6 }
 0x502   : > { %1296 = shalt.err (!%p1293_p3)
}
 0x503   : > { %s1297_s19 = scalar_lea.hbm %s1627_s26, 256  ;;  %s1301_s23 = scalar_lea.hbm %s1683_s12, 512 }
 0x504   : > { %p1298_p4 = scmp.ne.s32.totalorder %s1627_s26, %s1297_s19  ;;  %p1302_p9 = scmp.lt.s32.totalorder %s1627_s26, %s1683_s12 }
 0x505   : > { %p1303_p10 = scmp.lt.s32.totalorder %s1301_s23, %s1297_s19 }
 0x506   : > { %p1299_p7 = pnand %p1298_p4, %p1454_p5 }
 0x507   : > { %p1304_p11 = por %p1303_p10, %p1302_p9 }
 0x508   : > { %p1300_p8 = pneg %p1299_p7 }
 0x50a   : > { %p1305_p12 = pnand %p1304_p11, %p1300_p8 }
 0x50c   : > { %1308 = shalt.err (!%p1305_p12)
}
 0x50d   : > { %s1349_s29 = smov 128   ;;  %s1350_s25 = smov 8  }
 0x50e   : > { %1182 = dma.vmem_to_hbm [thread:$0]  (%p1454_p5), %s1629_s17, 256, %s1627_s26, %s1631_s16, %s1349_s29, %s1349_s29, %s1350_s25  }
 0x50f PF: > { %p1188_p13 = scmp.ge.s32.totalorder %s1343_s24, 2  ;;  %s1010_s28 = sand.u32 1, %s1331_s21  }
 0x510   : > { %s1011_s1 = scalar_lea.sflag [#allocation3], %s1010_s28 }
 0x511   : > { %p1185_p0 = pnand %p1188_p13, %p1458_p6 }
 0x513   : > { %p1186_p1 = pneg %p1185_p0 }
 0x515   : > { %1326 = dma.done.wait (%p1186_p1), %s1011_s1, 256  }
 0x516   : > { %1328 = vsyncadd (%p1186_p1), %s1011_s1, 4294967040  ;;  %s1691_s19 = sld [smem:[#allocation5_spill]]  ;;  %p22_p2 = scmp.ge.s32.totalorder %s1441_s27, 4  }
 0x517   : > { %s1692_s23 = sld [smem:[#allocation6_spill]]  ;;  %s1693_s21 = smov %s1335_s22 }
 0x518   : > { %s1695_s24 = smov %s1441_s27  ;;  %24 = sbr.rel (!%p22_p2) target bundleno = 5 (0x5), region = 106 }
 0x51c   : > { %s1694_s22 = smov %s1691_s19 }
 0x51d   :  { %1016 = vsyncpa [#allocation3], 1 }
 0x51e   :  { %1018 = vsyncpa [#allocation3 + $0x1], 1 }

</bundles_post_ra>
